<compile_context>
chip_gen: v7x
topology: tpu7x:2x2x1
jax: 0.10.0
libtpu: 0.0.40
codegen_flags: <defaults>
</compile_context>

<pallas_src>
import jax
import jax.numpy as jnp
from jax.experimental import pallas as pl
from jax.experimental.pallas import tpu as pltpu

POSE_DIMS = 7
JOINT_DIMS = 7
HIDDEN = 200
HIDDEN_PAD = 256                         # hidden dim zero-padded to 2 lane tiles
LATENT = 1
PACK_TRAIN_W = 16                        # [jc(7) | dp(7) | eps(1) | pad(1)]
PACK_EVAL_W = LATENT + POSE_DIMS         # [z(1) | dp(7)] = 8
OUT_TRAIN_W = JOINT_DIMS + 2 * LATENT    # packed [q | mean | log_var] = 9

LOWER_LIMITS = [-2.8973, -1.7628, -2.8973, -3.0718, -2.8973, -0.0175, -2.8973]
UPPER_LIMITS = [2.8973, 1.7628, 2.8973, -0.0698, 2.8973, 3.7525, 2.8973]

MAX_TILE_B = 4096        # big tiles amortize grid-step overhead (peak VMEM ~16-20 MiB)
_SPLIT_THRESHOLD = 512   # batches >= this get >= 2 grid steps (v7x megacore sharding)

_N_ENC = 12              # We0_16, be0, (W,b)x4, We5_T(f32), be5
_N_DEC_TRAIN = 13        # Wd0_z, Wd0_dp16, bd0, (W,b)x4, Wd5, bd5
_N_DEC_EVAL = 12         # Wd0_full8, bd0, (W,b)x4, Wd5, bd5


# --------------------------------------------------------------------------
# parameter construction / preprocessing
# --------------------------------------------------------------------------
def init_params(key):
  """Deterministic init matching the nn.Linear shapes in __init__ (W as (in,out))."""
  def linear(k, fan_in, fan_out):
    kw, kb = jax.random.split(k)
    bound = fan_in ** -0.5
    w = jax.random.uniform(kw, (fan_in, fan_out), jnp.float32, -bound, bound)
    b = jax.random.uniform(kb, (1, fan_out), jnp.float32, -bound, bound)
    return w, b

  enc_dims = ([(POSE_DIMS + JOINT_DIMS, HIDDEN)]
              + [(HIDDEN, HIDDEN)] * 4 + [(HIDDEN, 2 * LATENT)])
  dec_dims = ([(LATENT + POSE_DIMS, HIDDEN)]
              + [(HIDDEN, HIDDEN)] * 4 + [(HIDDEN, JOINT_DIMS)])
  keys = jax.random.split(key, len(enc_dims) + len(dec_dims))
  enc, dec = [], []
  for k, (fi, fo) in zip(keys[:len(enc_dims)], enc_dims):
    w, b = linear(k, fi, fo)
    enc += [w, b]
  for k, (fi, fo) in zip(keys[len(enc_dims):], dec_dims):
    w, b = linear(k, fi, fo)
    dec += [w, b]
  return enc, dec


def _pad2(x, rows, cols):
  return jnp.pad(x, ((0, rows - x.shape[0]), (0, cols - x.shape[1])))


def prepare_params(enc_params, dec_params):
  """Zero-pad hidden 200->256, build packed first-layer weights, cast W to bf16."""
  bf16 = jnp.bfloat16
  e, d = list(enc_params), list(dec_params)

  # ---------- encoder ----------
  # first layer over the packed (B,16) input: rows 0..6 = joint_config,
  # rows 7..13 = desired_pose, rows 14..15 = 0 (eps / pad contribute nothing).
  we0 = jnp.zeros((PACK_TRAIN_W, HIDDEN_PAD), jnp.float32)
  we0 = we0.at[:JOINT_DIMS + POSE_DIMS, :HIDDEN].set(e[0])
  enc_prep = [we0.astype(bf16),                             # (16, 256) bf16
              _pad2(e[1], 1, HIDDEN_PAD)]                   # (1, 256) f32
  for i in range(1, 5):
    enc_prep += [_pad2(e[2 * i], HIDDEN_PAD, HIDDEN_PAD).astype(bf16),
                 _pad2(e[2 * i + 1], 1, HIDDEN_PAD)]
  # latent head kept in f32 and transposed (computed on VPU/XLU, not MXU)
  we5_t = jnp.zeros((2 * LATENT, HIDDEN_PAD), jnp.float32)
  we5_t = we5_t.at[:, :HIDDEN].set(e[10].T)
  enc_prep += [we5_t,                                       # (2, 256) f32
               e[11]]                                       # (1, 2) f32

  # ---------- decoder ----------
  wd0 = d[0]                                                # (1+7, 200)
  wd0_z = _pad2(wd0[:LATENT], LATENT, HIDDEN_PAD).astype(bf16)        # (1, 256)
  wd0_dp16 = jnp.zeros((PACK_TRAIN_W, HIDDEN_PAD), jnp.float32)
  wd0_dp16 = wd0_dp16.at[JOINT_DIMS:JOINT_DIMS + POSE_DIMS,
                         :HIDDEN].set(wd0[LATENT:])                   # dp rows only
  wd0_full8 = _pad2(wd0, LATENT + POSE_DIMS, HIDDEN_PAD).astype(bf16)  # (8, 256)
  dec_prep = [wd0_z, wd0_dp16.astype(bf16), wd0_full8,
              _pad2(d[1], 1, HIDDEN_PAD)]                   # bd0 (1, 256) f32
  for i in range(1, 5):
    dec_prep += [_pad2(d[2 * i], HIDDEN_PAD, HIDDEN_PAD).astype(bf16),
                 _pad2(d[2 * i + 1], 1, HIDDEN_PAD)]
  dec_prep += [_pad2(d[10], HIDDEN_PAD, JOINT_DIMS).astype(bf16),   # (256, 7)
               d[11]]                                               # (1, 7) f32
  return enc_prep, dec_prep


def _limits():
  lo = jnp.array(LOWER_LIMITS, jnp.float32)
  hi = jnp.array(UPPER_LIMITS, jnp.float32)
  # row 0: 0.5 * joint_position_range, row 1: joint_position_mean
  return jnp.stack([0.5 * (hi - lo), 0.5 * (hi + lo)], axis=0)   # (2, 7)


# --------------------------------------------------------------------------
# kernels
# --------------------------------------------------------------------------
def _dense(h, w_ref, b_ref):
  """bf16 x bf16 matmul on the MXU, f32 accumulation, f32 bias add."""
  return jnp.dot(h.astype(jnp.bfloat16), w_ref[...],
                 preferred_element_type=jnp.float32) + b_ref[...]


def _hidden_tail(h, refs):
  """4 hidden ReLU layers (refs = [W1,b1,...,W4,b4])."""
  for i in range(4):
    h = jnp.maximum(_dense(h, refs[2 * i], refs[2 * i + 1]), 0.0)
  return h


def _train_kernel(x_ref, lim_ref, *refs):
  enc = refs[:_N_ENC]
  dec = refs[_N_ENC:_N_ENC + _N_DEC_TRAIN]
  out_ref = refs[_N_ENC + _N_DEC_TRAIN]

  x = x_ref[...]                                       # (tile_b, 16) f32
  x_b = x.astype(jnp.bfloat16)

  # encoder: single K=16 first-layer matmul over the packed [jc|dp|eps|0] input
  h = jnp.maximum(
      jnp.dot(x_b, enc[0][...], preferred_element_type=jnp.float32) + enc[1][...],
      0.0)
  h = _hidden_tail(h, enc[2:10])                       # (tile_b, 256) f32

  # latent head (256 -> 2) on the VPU/XLU in f32 (an MXU pass for N=2 would cost
  # as much as a full hidden layer); weights stored transposed as (2, 256) f32.
  wt = enc[10][...]
  b5 = enc[11][...]
  mean = jnp.sum(h * wt[0:1, :], axis=1, keepdims=True) + b5[:, 0:1]
  log_var = jnp.sum(h * wt[1:2, :], axis=1, keepdims=True) + b5[:, 1:2]

  # reparameterization trick (f32); eps lives in lane 14 of the packed input
  eps = x[:, 14:15]
  z = eps * jnp.exp(0.5 * log_var) + mean

  # decoder first layer: reuse x_b for the desired_pose rows (jc/eps rows of the
  # packed weight are zero); LATENT==1 z contribution is a broadcast multiply.
  z_b = z.astype(jnp.bfloat16).astype(jnp.float32)     # match reference bf16 cast
  g = (z_b * dec[0][...].astype(jnp.float32)
       + jnp.dot(x_b, dec[1][...], preferred_element_type=jnp.float32)
       + dec[2][...])
  g = jnp.maximum(g, 0.0)
  g = _hidden_tail(g, dec[3:11])
  out = jnp.tanh(_dense(g, dec[11], dec[12]))          # (tile_b, 7) f32
  q = out * lim_ref[0:1, :] + lim_ref[1:2, :]

  # single lane-packed full-block store: [q(7) | mean(1) | log_var(1)]
  out_ref[...] = jnp.concatenate([q, mean, log_var], axis=1)


def _eval_kernel(x_ref, lim_ref, *refs):
  dec = refs[:_N_DEC_EVAL]
  out_ref = refs[_N_DEC_EVAL]

  x_b = x_ref[...].astype(jnp.bfloat16)                # (tile_b, 8) = [z | dp]
  g = jnp.maximum(
      jnp.dot(x_b, dec[0][...], preferred_element_type=jnp.float32) + dec[1][...],
      0.0)
  g = _hidden_tail(g, dec[2:10])
  out = jnp.tanh(_dense(g, dec[10], dec[11]))
  out_ref[...] = out * lim_ref[0:1, :] + lim_ref[1:2, :]


# --------------------------------------------------------------------------
# wrappers
# --------------------------------------------------------------------------
def _round_up(x, m):
  return ((x + m - 1) // m) * m


def _tiling(batch):
  """Pick (tile_b, padded_b).  Batches >= _SPLIT_THRESHOLD get >= 2 grid steps so
  the 'parallel' batch axis can shard across v7x's two TensorCores; rows rounded
  to 8 to minimize zero-row padding while keeping sublane alignment."""
  if batch < _SPLIT_THRESHOLD:
    tile = _round_up(max(batch, 1), 8)
    return tile, tile
  steps = max(2, -(-batch // MAX_TILE_B))
  tile = min(MAX_TILE_B, _round_up(-(-batch // steps), 8))
  padded = _round_up(batch, tile)
  return tile, padded


def _pad_rows(x, rows):
  if x.shape[0] == rows:
    return x
  return jnp.pad(x, ((0, rows - x.shape[0]), (0, 0)))


def _batch_spec(tile_b, width):
  return pl.BlockSpec((tile_b, width), lambda i: (i, 0))


def _resident_spec(arr):
  # Same block for every grid step -> stays resident in VMEM across the batch.
  return pl.BlockSpec(arr.shape, lambda i: (0, 0))


_COMPILER_PARAMS = pltpu.CompilerParams(
    dimension_semantics=("parallel",),        # megacore sharding on v7x
    vmem_limit_bytes=32 * 1024 * 1024)


def _cost(padded_b, train):
  hid = 4 * HIDDEN_PAD * HIDDEN_PAD
  if train:
    macs = (PACK_TRAIN_W * HIDDEN_PAD + hid + 2 * HIDDEN_PAD          # encoder
            + HIDDEN_PAD + PACK_TRAIN_W * HIDDEN_PAD + hid            # decoder
            + HIDDEN_PAD * JOINT_DIMS)
    trans = JOINT_DIMS + LATENT
    io_w = PACK_TRAIN_W + OUT_TRAIN_W
  else:
    macs = PACK_EVAL_W * HIDDEN_PAD + hid + HIDDEN_PAD * JOINT_DIMS
    trans = JOINT_DIMS
    io_w = PACK_EVAL_W + JOINT_DIMS
  param_bytes = 2 * macs + 16 * HIDDEN_PAD * 4          # bf16 weights + f32 biases
  return pl.CostEstimate(flops=2 * macs * padded_b,
                         transcendentals=trans * padded_b,
                         bytes_accessed=param_bytes + 4 * padded_b * io_w)


@jax.jit
def cvae_forward_train(desired_pose, joint_config, eps, enc_prep, dec_prep):
  """Training-mode forward: returns (q, mean, log_variance)."""
  batch = desired_pose.shape[0]
  tile_b, padded_b = _tiling(batch)

  # pack [jc | dp | eps | 0] -> (B, 16), lane-contiguous single streaming input
  x = jnp.concatenate(
      [joint_config, desired_pose, eps,
       jnp.zeros((batch, PACK_TRAIN_W - 2 * POSE_DIMS - LATENT), jnp.float32)],
      axis=1)
  x = _pad_rows(x, padded_b)
  lim = _limits()
  dec_train = [dec_prep[0], dec_prep[1]] + list(dec_prep[3:])
  params = list(enc_prep) + dec_train

  in_specs = ([_batch_spec(tile_b, PACK_TRAIN_W), _resident_spec(lim)]
              + [_resident_spec(p) for p in params])

  out = pl.pallas_call(
      _train_kernel,
      out_shape=jax.ShapeDtypeStruct((padded_b, OUT_TRAIN_W), jnp.float32),
      grid=(padded_b // tile_b,),
      in_specs=in_specs,
      out_specs=_batch_spec(tile_b, OUT_TRAIN_W),
      compiler_params=_COMPILER_PARAMS,
      cost_estimate=_cost(padded_b, train=True),
  )(x, lim, *params)

  q = out[:batch, :JOINT_DIMS]
  mean = out[:batch, JOINT_DIMS:JOINT_DIMS + LATENT]
  log_var = out[:batch, JOINT_DIMS + LATENT:]
  return q, mean, log_var


@jax.jit
def cvae_forward_eval(desired_pose, z, dec_prep):
  """Eval-mode forward: returns q (z must be supplied; noise drawn by caller)."""
  batch = desired_pose.shape[0]
  tile_b, padded_b = _tiling(batch)

  x = jnp.concatenate([z, desired_pose], axis=1)        # (B, 8) = [z | dp]
  x = _pad_rows(x, padded_b)
  lim = _limits()
  params = [dec_prep[2]] + list(dec_prep[3:])

  in_specs = ([_batch_spec(tile_b, PACK_EVAL_W), _resident_spec(lim)]
              + [_resident_spec(p) for p in params])

  out = pl.pallas_call(
      _eval_kernel,
      out_shape=jax.ShapeDtypeStruct((padded_b, JOINT_DIMS), jnp.float32),
      grid=(padded_b // tile_b,),
      in_specs=in_specs,
      out_specs=_batch_spec(tile_b, JOINT_DIMS),
      compiler_params=_COMPILER_PARAMS,
      cost_estimate=_cost(padded_b, train=False),
  )(x, lim, *params)

  return out[:batch]


# --------------------------------------------------------------------------
# plain-JAX reference (original unpadded params; same precision choices:
# bf16 matmuls for hidden layers / decoder, f32 for the tiny encoder head)
# --------------------------------------------------------------------------
def _bf16_dense(h, w, b):
  return jnp.dot(h.astype(jnp.bfloat16), w.astype(jnp.bfloat16),
                 preferred_element_type=jnp.float32) + b


def _ref_encoder(x, enc):
  h = x
  for i in range(5):
    h = jnp.maximum(_bf16_dense(h, enc[2 * i], enc[2 * i + 1]), 0.0)
  return jnp.dot(h, enc[10], preferred_element_type=jnp.float32) + enc[11]


def _ref_decoder(x, dec):
  h = x
  for i in range(5):
    h = jnp.maximum(_bf16_dense(h, dec[2 * i], dec[2 * i + 1]), 0.0)
  return jnp.tanh(_bf16_dense(h, dec[10], dec[11]))


def _ref_train(dp, jc, eps, enc, dec):
  lim = _limits()
  lat = _ref_encoder(jnp.concatenate([jc, dp], axis=1), enc)
  mu, lv = lat[:, :LATENT], lat[:, LATENT:]
  z = eps * jnp.exp(0.5 * lv) + mu
  out = _ref_decoder(jnp.concatenate([z, dp], axis=1), dec)
  return out * lim[0:1] + lim[1:2], mu, lv


def _ref_eval(dp, z, dec):
  lim = _limits()
  out = _ref_decoder(jnp.concatenate([z, dp], axis=1), dec)
  return out * lim[0:1] + lim[1:2]


if __name__ == "__main__":
  key = jax.random.PRNGKey(0)
  (k_params, k_pose, k_joint, k_eps, k_z,
   k_pose2, k_joint2, k_eps2) = jax.random.split(key, 8)

  enc_params, dec_params = init_params(k_params)
  enc_prep, dec_prep = prepare_params(enc_params, dec_params)

  # tolerance reflects bf16 matmul precision (same cast points in the reference;
  # residual deltas come from accumulation order only)
  TOL = dict(atol=2e-2, rtol=2e-2)

  # ---- small batch (grid = 1 tile) ----
  B = 2
  desired_pose = jax.random.normal(k_pose, (B, POSE_DIMS), jnp.float32)
  joint_config = jax.random.normal(k_joint, (B, JOINT_DIMS), jnp.float32)
  eps = jax.random.normal(k_eps, (B, LATENT), jnp.float32)     # std-normal noise
  z = jax.random.normal(k_z, (B, LATENT), jnp.float32)

  q, mean, log_var = cvae_forward_train(desired_pose, joint_config, eps,
                                        enc_prep, dec_prep)
  jax.block_until_ready((q, mean, log_var))
  q_eval = cvae_forward_eval(desired_pose, z, dec_prep)
  jax.block_until_ready(q_eval)

  q_r, mu_r, lv_r = _ref_train(desired_pose, joint_config, eps, enc_params, dec_params)
  q_e_r = _ref_eval(desired_pose, z, dec_params)
  assert jnp.allclose(q, q_r, **TOL), "train q mismatch"
  assert jnp.allclose(mean, mu_r, **TOL), "mean mismatch"
  assert jnp.allclose(log_var, lv_r, **TOL), "log_variance mismatch"
  assert jnp.allclose(q_eval, q_e_r, **TOL), "eval q mismatch"

  # ---- larger batch exercising the tiled / pipelined 2-step grid path ----
  B2 = 1030   # tile = 520 rows, padded to 1040, grid = (2,)
  dp2 = jax.random.normal(k_pose2, (B2, POSE_DIMS), jnp.float32)
  jc2 = jax.random.normal(k_joint2, (B2, JOINT_DIMS), jnp.float32)
  eps2 = jax.random.normal(k_eps2, (B2, LATENT), jnp.float32)
  q2, mu2, lv2 = cvae_forward_train(dp2, jc2, eps2, enc_prep, dec_prep)
  jax.block_until_ready((q2, mu2, lv2))
  q2_r, mu2_r, lv2_r = _ref_train(dp2, jc2, eps2, enc_params, dec_params)
  assert jnp.allclose(q2, q2_r, **TOL), "tiled train q mismatch"
  assert jnp.allclose(mu2, mu2_r, **TOL), "tiled mean mismatch"
  assert jnp.allclose(lv2, lv2_r, **TOL), "tiled log_variance mismatch"

  q2_e = cvae_forward_eval(dp2, eps2, dec_prep)
  jax.block_until_ready(q2_e)
  assert jnp.allclose(q2_e, _ref_eval(dp2, eps2, dec_params), **TOL), \
      "tiled eval q mismatch"

  print("KERNEL_OK")
</pallas_src>

<mosaic_0001>
module attributes {stable_mosaic.version = 11 : i64} {
  func.func @_train_kernel(%arg0: i32, %arg1: memref<8x16xf32, #tpu.memory_space<vmem>>, %arg2: memref<2x7xf32, #tpu.memory_space<vmem>>, %arg3: memref<16x256xbf16, #tpu.memory_space<vmem>>, %arg4: memref<1x256xf32, #tpu.memory_space<vmem>>, %arg5: memref<256x256xbf16, #tpu.memory_space<vmem>>, %arg6: memref<1x256xf32, #tpu.memory_space<vmem>>, %arg7: memref<256x256xbf16, #tpu.memory_space<vmem>>, %arg8: memref<1x256xf32, #tpu.memory_space<vmem>>, %arg9: memref<256x256xbf16, #tpu.memory_space<vmem>>, %arg10: memref<1x256xf32, #tpu.memory_space<vmem>>, %arg11: memref<256x256xbf16, #tpu.memory_space<vmem>>, %arg12: memref<1x256xf32, #tpu.memory_space<vmem>>, %arg13: memref<2x256xf32, #tpu.memory_space<vmem>>, %arg14: memref<1x2xf32, #tpu.memory_space<vmem>>, %arg15: memref<1x256xbf16, #tpu.memory_space<vmem>>, %arg16: memref<16x256xbf16, #tpu.memory_space<vmem>>, %arg17: memref<1x256xf32, #tpu.memory_space<vmem>>, %arg18: memref<256x256xbf16, #tpu.memory_space<vmem>>, %arg19: memref<1x256xf32, #tpu.memory_space<vmem>>, %arg20: memref<256x256xbf16, #tpu.memory_space<vmem>>, %arg21: memref<1x256xf32, #tpu.memory_space<vmem>>, %arg22: memref<256x256xbf16, #tpu.memory_space<vmem>>, %arg23: memref<1x256xf32, #tpu.memory_space<vmem>>, %arg24: memref<256x256xbf16, #tpu.memory_space<vmem>>, %arg25: memref<1x256xf32, #tpu.memory_space<vmem>>, %arg26: memref<256x7xbf16, #tpu.memory_space<vmem>>, %arg27: memref<1x7xf32, #tpu.memory_space<vmem>>, %arg28: memref<8x9xf32, #tpu.memory_space<vmem>>) attributes {dimension_semantics = [#tpu.dimension_semantics<parallel>], iteration_bounds = array<i64: 1>, scalar_prefetch = 0 : i64, scratch_operands = 0 : i64, tpu.core_type = #tpu.core_type<tc>, window_params = [{transform_indices = @transform_0, window_bounds = array<i64: 8, 16>}, {pipeline_mode = #tpu.pipeline_mode<synchronous>, transform_indices = @transform_1, window_bounds = array<i64: 2, 7>}, {pipeline_mode = #tpu.pipeline_mode<synchronous>, transform_indices = @transform_2, window_bounds = array<i64: 16, 256>}, {pipeline_mode = #tpu.pipeline_mode<synchronous>, transform_indices = @transform_3, window_bounds = array<i64: 1, 256>}, {pipeline_mode = #tpu.pipeline_mode<synchronous>, transform_indices = @transform_4, window_bounds = array<i64: 256, 256>}, {pipeline_mode = #tpu.pipeline_mode<synchronous>, transform_indices = @transform_5, window_bounds = array<i64: 1, 256>}, {pipeline_mode = #tpu.pipeline_mode<synchronous>, transform_indices = @transform_6, window_bounds = array<i64: 256, 256>}, {pipeline_mode = #tpu.pipeline_mode<synchronous>, transform_indices = @transform_7, window_bounds = array<i64: 1, 256>}, {pipeline_mode = #tpu.pipeline_mode<synchronous>, transform_indices = @transform_8, window_bounds = array<i64: 256, 256>}, {pipeline_mode = #tpu.pipeline_mode<synchronous>, transform_indices = @transform_9, window_bounds = array<i64: 1, 256>}, {pipeline_mode = #tpu.pipeline_mode<synchronous>, transform_indices = @transform_10, window_bounds = array<i64: 256, 256>}, {pipeline_mode = #tpu.pipeline_mode<synchronous>, transform_indices = @transform_11, window_bounds = array<i64: 1, 256>}, {pipeline_mode = #tpu.pipeline_mode<synchronous>, transform_indices = @transform_12, window_bounds = array<i64: 2, 256>}, {pipeline_mode = #tpu.pipeline_mode<synchronous>, transform_indices = @transform_13, window_bounds = array<i64: 1, 2>}, {pipeline_mode = #tpu.pipeline_mode<synchronous>, transform_indices = @transform_14, window_bounds = array<i64: 1, 256>}, {pipeline_mode = #tpu.pipeline_mode<synchronous>, transform_indices = @transform_15, window_bounds = array<i64: 16, 256>}, {pipeline_mode = #tpu.pipeline_mode<synchronous>, transform_indices = @transform_16, window_bounds = array<i64: 1, 256>}, {pipeline_mode = #tpu.pipeline_mode<synchronous>, transform_indices = @transform_17, window_bounds = array<i64: 256, 256>}, {pipeline_mode = #tpu.pipeline_mode<synchronous>, transform_indices = @transform_18, window_bounds = array<i64: 1, 256>}, {pipeline_mode = #tpu.pipeline_mode<synchronous>, transform_indices = @transform_19, window_bounds = array<i64: 256, 256>}, {pipeline_mode = #tpu.pipeline_mode<synchronous>, transform_indices = @transform_20, window_bounds = array<i64: 1, 256>}, {pipeline_mode = #tpu.pipeline_mode<synchronous>, transform_indices = @transform_21, window_bounds = array<i64: 256, 256>}, {pipeline_mode = #tpu.pipeline_mode<synchronous>, transform_indices = @transform_22, window_bounds = array<i64: 1, 256>}, {pipeline_mode = #tpu.pipeline_mode<synchronous>, transform_indices = @transform_23, window_bounds = array<i64: 256, 256>}, {pipeline_mode = #tpu.pipeline_mode<synchronous>, transform_indices = @transform_24, window_bounds = array<i64: 1, 256>}, {pipeline_mode = #tpu.pipeline_mode<synchronous>, transform_indices = @transform_25, window_bounds = array<i64: 256, 7>}, {pipeline_mode = #tpu.pipeline_mode<synchronous>, transform_indices = @transform_26, window_bounds = array<i64: 1, 7>}, {transform_indices = @transform_27, window_bounds = array<i64: 8, 9>}]} {
    %c0 = arith.constant 0 : index
    %c0_0 = arith.constant 0 : index
    %0 = vector.load %arg1[%c0, %c0_0] : memref<8x16xf32, #tpu.memory_space<vmem>>, vector<8x16xf32>
    %1 = arith.truncf %0 : vector<8x16xf32> to vector<8x16xbf16>
    %c0_1 = arith.constant 0 : index
    %c0_2 = arith.constant 0 : index
    %2 = vector.load %arg3[%c0_1, %c0_2] : memref<16x256xbf16, #tpu.memory_space<vmem>>, vector<16x256xbf16>
    %cst = arith.constant dense<0.000000e+00> : vector<8x256xf32>
    %3 = tpu.matmul %1, %2, %cst {dimension_numbers = #tpu.dot_dimension_numbers<[1], [0], [0], [1], [0, 0, 1, 1], [], []>} : vector<8x16xbf16>, vector<16x256xbf16>, vector<8x256xf32> -> vector<8x256xf32>
    %c0_3 = arith.constant 0 : index
    %c0_4 = arith.constant 0 : index
    %4 = vector.load %arg4[%c0_3, %c0_4] : memref<1x256xf32, #tpu.memory_space<vmem>>, vector<1x256xf32>
    %5 = vector.broadcast %4 : vector<1x256xf32> to vector<8x256xf32>
    %6 = arith.addf %3, %5 : vector<8x256xf32>
    %cst_5 = arith.constant 0.000000e+00 : f32
    %7 = vector.broadcast %cst_5 : f32 to vector<8x256xf32>
    %8 = arith.maximumf %6, %7 : vector<8x256xf32>
    %9 = arith.truncf %8 : vector<8x256xf32> to vector<8x256xbf16>
    %c0_6 = arith.constant 0 : index
    %c0_7 = arith.constant 0 : index
    %10 = vector.load %arg5[%c0_6, %c0_7] : memref<256x256xbf16, #tpu.memory_space<vmem>>, vector<256x256xbf16>
    %cst_8 = arith.constant dense<0.000000e+00> : vector<8x256xf32>
    %11 = tpu.matmul %9, %10, %cst_8 {dimension_numbers = #tpu.dot_dimension_numbers<[1], [0], [0], [1], [0, 0, 1, 1], [], []>} : vector<8x256xbf16>, vector<256x256xbf16>, vector<8x256xf32> -> vector<8x256xf32>
    %c0_9 = arith.constant 0 : index
    %c0_10 = arith.constant 0 : index
    %12 = vector.load %arg6[%c0_9, %c0_10] : memref<1x256xf32, #tpu.memory_space<vmem>>, vector<1x256xf32>
    %13 = vector.broadcast %12 : vector<1x256xf32> to vector<8x256xf32>
    %14 = arith.addf %11, %13 : vector<8x256xf32>
    %cst_11 = arith.constant 0.000000e+00 : f32
    %15 = vector.broadcast %cst_11 : f32 to vector<8x256xf32>
    %16 = arith.maximumf %14, %15 : vector<8x256xf32>
    %17 = arith.truncf %16 : vector<8x256xf32> to vector<8x256xbf16>
    %c0_12 = arith.constant 0 : index
    %c0_13 = arith.constant 0 : index
    %18 = vector.load %arg7[%c0_12, %c0_13] : memref<256x256xbf16, #tpu.memory_space<vmem>>, vector<256x256xbf16>
    %cst_14 = arith.constant dense<0.000000e+00> : vector<8x256xf32>
    %19 = tpu.matmul %17, %18, %cst_14 {dimension_numbers = #tpu.dot_dimension_numbers<[1], [0], [0], [1], [0, 0, 1, 1], [], []>} : vector<8x256xbf16>, vector<256x256xbf16>, vector<8x256xf32> -> vector<8x256xf32>
    %c0_15 = arith.constant 0 : index
    %c0_16 = arith.constant 0 : index
    %20 = vector.load %arg8[%c0_15, %c0_16] : memref<1x256xf32, #tpu.memory_space<vmem>>, vector<1x256xf32>
    %21 = vector.broadcast %20 : vector<1x256xf32> to vector<8x256xf32>
    %22 = arith.addf %19, %21 : vector<8x256xf32>
    %cst_17 = arith.constant 0.000000e+00 : f32
    %23 = vector.broadcast %cst_17 : f32 to vector<8x256xf32>
    %24 = arith.maximumf %22, %23 : vector<8x256xf32>
    %25 = arith.truncf %24 : vector<8x256xf32> to vector<8x256xbf16>
    %c0_18 = arith.constant 0 : index
    %c0_19 = arith.constant 0 : index
    %26 = vector.load %arg9[%c0_18, %c0_19] : memref<256x256xbf16, #tpu.memory_space<vmem>>, vector<256x256xbf16>
    %cst_20 = arith.constant dense<0.000000e+00> : vector<8x256xf32>
    %27 = tpu.matmul %25, %26, %cst_20 {dimension_numbers = #tpu.dot_dimension_numbers<[1], [0], [0], [1], [0, 0, 1, 1], [], []>} : vector<8x256xbf16>, vector<256x256xbf16>, vector<8x256xf32> -> vector<8x256xf32>
    %c0_21 = arith.constant 0 : index
    %c0_22 = arith.constant 0 : index
    %28 = vector.load %arg10[%c0_21, %c0_22] : memref<1x256xf32, #tpu.memory_space<vmem>>, vector<1x256xf32>
    %29 = vector.broadcast %28 : vector<1x256xf32> to vector<8x256xf32>
    %30 = arith.addf %27, %29 : vector<8x256xf32>
    %cst_23 = arith.constant 0.000000e+00 : f32
    %31 = vector.broadcast %cst_23 : f32 to vector<8x256xf32>
    %32 = arith.maximumf %30, %31 : vector<8x256xf32>
    %33 = arith.truncf %32 : vector<8x256xf32> to vector<8x256xbf16>
    %c0_24 = arith.constant 0 : index
    %c0_25 = arith.constant 0 : index
    %34 = vector.load %arg11[%c0_24, %c0_25] : memref<256x256xbf16, #tpu.memory_space<vmem>>, vector<256x256xbf16>
    %cst_26 = arith.constant dense<0.000000e+00> : vector<8x256xf32>
    %35 = tpu.matmul %33, %34, %cst_26 {dimension_numbers = #tpu.dot_dimension_numbers<[1], [0], [0], [1], [0, 0, 1, 1], [], []>} : vector<8x256xbf16>, vector<256x256xbf16>, vector<8x256xf32> -> vector<8x256xf32>
    %c0_27 = arith.constant 0 : index
    %c0_28 = arith.constant 0 : index
    %36 = vector.load %arg12[%c0_27, %c0_28] : memref<1x256xf32, #tpu.memory_space<vmem>>, vector<1x256xf32>
    %37 = vector.broadcast %36 : vector<1x256xf32> to vector<8x256xf32>
    %38 = arith.addf %35, %37 : vector<8x256xf32>
    %cst_29 = arith.constant 0.000000e+00 : f32
    %39 = vector.broadcast %cst_29 : f32 to vector<8x256xf32>
    %40 = arith.maximumf %38, %39 : vector<8x256xf32>
    %c0_30 = arith.constant 0 : index
    %c0_31 = arith.constant 0 : index
    %41 = vector.load %arg13[%c0_30, %c0_31] : memref<2x256xf32, #tpu.memory_space<vmem>>, vector<2x256xf32>
    %c0_32 = arith.constant 0 : index
    %c0_33 = arith.constant 0 : index
    %42 = vector.load %arg14[%c0_32, %c0_33] : memref<1x2xf32, #tpu.memory_space<vmem>>, vector<1x2xf32>
    %43 = vector.extract_strided_slice %41 {offsets = [0, 0], sizes = [1, 256], strides = [1, 1]} : vector<2x256xf32> to vector<1x256xf32>
    %44 = vector.broadcast %43 : vector<1x256xf32> to vector<8x256xf32>
    %45 = arith.mulf %40, %44 : vector<8x256xf32>
    %cst_34 = arith.constant dense<0.000000e+00> : vector<8xf32>
    %46 = vector.multi_reduction <add>, %45, %cst_34 [1] : vector<8x256xf32> to vector<8xf32>
    %47 = vector.shape_cast %46 : vector<8xf32> to vector<8x1xf32>
    %48 = vector.extract_strided_slice %42 {offsets = [0, 0], sizes = [1, 1], strides = [1, 1]} : vector<1x2xf32> to vector<1x1xf32>
    %49 = vector.broadcast %48 : vector<1x1xf32> to vector<8x1xf32>
    %50 = arith.addf %47, %49 : vector<8x1xf32>
    %51 = vector.extract_strided_slice %41 {offsets = [1, 0], sizes = [1, 256], strides = [1, 1]} : vector<2x256xf32> to vector<1x256xf32>
    %52 = vector.broadcast %51 : vector<1x256xf32> to vector<8x256xf32>
    %53 = arith.mulf %40, %52 : vector<8x256xf32>
    %cst_35 = arith.constant dense<0.000000e+00> : vector<8xf32>
    %54 = vector.multi_reduction <add>, %53, %cst_35 [1] : vector<8x256xf32> to vector<8xf32>
    %55 = vector.shape_cast %54 : vector<8xf32> to vector<8x1xf32>
    %56 = vector.extract_strided_slice %42 {offsets = [0, 1], sizes = [1, 1], strides = [1, 1]} : vector<1x2xf32> to vector<1x1xf32>
    %57 = vector.broadcast %56 : vector<1x1xf32> to vector<8x1xf32>
    %58 = arith.addf %55, %57 : vector<8x1xf32>
    %59 = vector.extract_strided_slice %0 {offsets = [0, 14], sizes = [8, 1], strides = [1, 1]} : vector<8x16xf32> to vector<8x1xf32>
    %cst_36 = arith.constant 5.000000e-01 : f32
    %60 = vector.broadcast %cst_36 : f32 to vector<8x1xf32>
    %61 = arith.mulf %60, %58 : vector<8x1xf32>
    %62 = math.exp %61 : vector<8x1xf32>
    %63 = arith.mulf %59, %62 : vector<8x1xf32>
    %64 = arith.addf %63, %50 : vector<8x1xf32>
    %65 = arith.truncf %64 : vector<8x1xf32> to vector<8x1xbf16>
    %66 = arith.extf %65 : vector<8x1xbf16> to vector<8x1xf32>
    %c0_37 = arith.constant 0 : index
    %c0_38 = arith.constant 0 : index
    %67 = vector.load %arg15[%c0_37, %c0_38] : memref<1x256xbf16, #tpu.memory_space<vmem>>, vector<1x256xbf16>
    %68 = arith.extf %67 : vector<1x256xbf16> to vector<1x256xf32>
    %69 = vector.broadcast %66 : vector<8x1xf32> to vector<8x256xf32>
    %70 = vector.broadcast %68 : vector<1x256xf32> to vector<8x256xf32>
    %71 = arith.mulf %69, %70 : vector<8x256xf32>
    %c0_39 = arith.constant 0 : index
    %c0_40 = arith.constant 0 : index
    %72 = vector.load %arg16[%c0_39, %c0_40] : memref<16x256xbf16, #tpu.memory_space<vmem>>, vector<16x256xbf16>
    %cst_41 = arith.constant dense<0.000000e+00> : vector<8x256xf32>
    %73 = tpu.matmul %1, %72, %cst_41 {dimension_numbers = #tpu.dot_dimension_numbers<[1], [0], [0], [1], [0, 0, 1, 1], [], []>} : vector<8x16xbf16>, vector<16x256xbf16>, vector<8x256xf32> -> vector<8x256xf32>
    %74 = arith.addf %71, %73 : vector<8x256xf32>
    %c0_42 = arith.constant 0 : index
    %c0_43 = arith.constant 0 : index
    %75 = vector.load %arg17[%c0_42, %c0_43] : memref<1x256xf32, #tpu.memory_space<vmem>>, vector<1x256xf32>
    %76 = vector.broadcast %75 : vector<1x256xf32> to vector<8x256xf32>
    %77 = arith.addf %74, %76 : vector<8x256xf32>
    %cst_44 = arith.constant 0.000000e+00 : f32
    %78 = vector.broadcast %cst_44 : f32 to vector<8x256xf32>
    %79 = arith.maximumf %77, %78 : vector<8x256xf32>
    %80 = arith.truncf %79 : vector<8x256xf32> to vector<8x256xbf16>
    %c0_45 = arith.constant 0 : index
    %c0_46 = arith.constant 0 : index
    %81 = vector.load %arg18[%c0_45, %c0_46] : memref<256x256xbf16, #tpu.memory_space<vmem>>, vector<256x256xbf16>
    %cst_47 = arith.constant dense<0.000000e+00> : vector<8x256xf32>
    %82 = tpu.matmul %80, %81, %cst_47 {dimension_numbers = #tpu.dot_dimension_numbers<[1], [0], [0], [1], [0, 0, 1, 1], [], []>} : vector<8x256xbf16>, vector<256x256xbf16>, vector<8x256xf32> -> vector<8x256xf32>
    %c0_48 = arith.constant 0 : index
    %c0_49 = arith.constant 0 : index
    %83 = vector.load %arg19[%c0_48, %c0_49] : memref<1x256xf32, #tpu.memory_space<vmem>>, vector<1x256xf32>
    %84 = vector.broadcast %83 : vector<1x256xf32> to vector<8x256xf32>
    %85 = arith.addf %82, %84 : vector<8x256xf32>
    %cst_50 = arith.constant 0.000000e+00 : f32
    %86 = vector.broadcast %cst_50 : f32 to vector<8x256xf32>
    %87 = arith.maximumf %85, %86 : vector<8x256xf32>
    %88 = arith.truncf %87 : vector<8x256xf32> to vector<8x256xbf16>
    %c0_51 = arith.constant 0 : index
    %c0_52 = arith.constant 0 : index
    %89 = vector.load %arg20[%c0_51, %c0_52] : memref<256x256xbf16, #tpu.memory_space<vmem>>, vector<256x256xbf16>
    %cst_53 = arith.constant dense<0.000000e+00> : vector<8x256xf32>
    %90 = tpu.matmul %88, %89, %cst_53 {dimension_numbers = #tpu.dot_dimension_numbers<[1], [0], [0], [1], [0, 0, 1, 1], [], []>} : vector<8x256xbf16>, vector<256x256xbf16>, vector<8x256xf32> -> vector<8x256xf32>
    %c0_54 = arith.constant 0 : index
    %c0_55 = arith.constant 0 : index
    %91 = vector.load %arg21[%c0_54, %c0_55] : memref<1x256xf32, #tpu.memory_space<vmem>>, vector<1x256xf32>
    %92 = vector.broadcast %91 : vector<1x256xf32> to vector<8x256xf32>
    %93 = arith.addf %90, %92 : vector<8x256xf32>
    %cst_56 = arith.constant 0.000000e+00 : f32
    %94 = vector.broadcast %cst_56 : f32 to vector<8x256xf32>
    %95 = arith.maximumf %93, %94 : vector<8x256xf32>
    %96 = arith.truncf %95 : vector<8x256xf32> to vector<8x256xbf16>
    %c0_57 = arith.constant 0 : index
    %c0_58 = arith.constant 0 : index
    %97 = vector.load %arg22[%c0_57, %c0_58] : memref<256x256xbf16, #tpu.memory_space<vmem>>, vector<256x256xbf16>
    %cst_59 = arith.constant dense<0.000000e+00> : vector<8x256xf32>
    %98 = tpu.matmul %96, %97, %cst_59 {dimension_numbers = #tpu.dot_dimension_numbers<[1], [0], [0], [1], [0, 0, 1, 1], [], []>} : vector<8x256xbf16>, vector<256x256xbf16>, vector<8x256xf32> -> vector<8x256xf32>
    %c0_60 = arith.constant 0 : index
    %c0_61 = arith.constant 0 : index
    %99 = vector.load %arg23[%c0_60, %c0_61] : memref<1x256xf32, #tpu.memory_space<vmem>>, vector<1x256xf32>
    %100 = vector.broadcast %99 : vector<1x256xf32> to vector<8x256xf32>
    %101 = arith.addf %98, %100 : vector<8x256xf32>
    %cst_62 = arith.constant 0.000000e+00 : f32
    %102 = vector.broadcast %cst_62 : f32 to vector<8x256xf32>
    %103 = arith.maximumf %101, %102 : vector<8x256xf32>
    %104 = arith.truncf %103 : vector<8x256xf32> to vector<8x256xbf16>
    %c0_63 = arith.constant 0 : index
    %c0_64 = arith.constant 0 : index
    %105 = vector.load %arg24[%c0_63, %c0_64] : memref<256x256xbf16, #tpu.memory_space<vmem>>, vector<256x256xbf16>
    %cst_65 = arith.constant dense<0.000000e+00> : vector<8x256xf32>
    %106 = tpu.matmul %104, %105, %cst_65 {dimension_numbers = #tpu.dot_dimension_numbers<[1], [0], [0], [1], [0, 0, 1, 1], [], []>} : vector<8x256xbf16>, vector<256x256xbf16>, vector<8x256xf32> -> vector<8x256xf32>
    %c0_66 = arith.constant 0 : index
    %c0_67 = arith.constant 0 : index
    %107 = vector.load %arg25[%c0_66, %c0_67] : memref<1x256xf32, #tpu.memory_space<vmem>>, vector<1x256xf32>
    %108 = vector.broadcast %107 : vector<1x256xf32> to vector<8x256xf32>
    %109 = arith.addf %106, %108 : vector<8x256xf32>
    %cst_68 = arith.constant 0.000000e+00 : f32
    %110 = vector.broadcast %cst_68 : f32 to vector<8x256xf32>
    %111 = arith.maximumf %109, %110 : vector<8x256xf32>
    %112 = arith.truncf %111 : vector<8x256xf32> to vector<8x256xbf16>
    %c0_69 = arith.constant 0 : index
    %c0_70 = arith.constant 0 : index
    %113 = vector.load %arg26[%c0_69, %c0_70] : memref<256x7xbf16, #tpu.memory_space<vmem>>, vector<256x7xbf16>
    %cst_71 = arith.constant dense<0.000000e+00> : vector<8x7xf32>
    %114 = tpu.matmul %112, %113, %cst_71 {dimension_numbers = #tpu.dot_dimension_numbers<[1], [0], [0], [1], [0, 0, 1, 1], [], []>} : vector<8x256xbf16>, vector<256x7xbf16>, vector<8x7xf32> -> vector<8x7xf32>
    %c0_72 = arith.constant 0 : index
    %c0_73 = arith.constant 0 : index
    %115 = vector.load %arg27[%c0_72, %c0_73] : memref<1x7xf32, #tpu.memory_space<vmem>>, vector<1x7xf32>
    %116 = vector.broadcast %115 : vector<1x7xf32> to vector<8x7xf32>
    %117 = arith.addf %114, %116 : vector<8x7xf32>
    %118 = math.tanh %117 : vector<8x7xf32>
    %c0_74 = arith.constant 0 : index
    %c0_75 = arith.constant 0 : index
    %119 = vector.load %arg2[%c0_74, %c0_75] : memref<2x7xf32, #tpu.memory_space<vmem>>, vector<1x7xf32>
    %120 = vector.broadcast %119 : vector<1x7xf32> to vector<8x7xf32>
    %121 = arith.mulf %118, %120 : vector<8x7xf32>
    %c1 = arith.constant 1 : index
    %c0_76 = arith.constant 0 : index
    %122 = vector.load %arg2[%c1, %c0_76] : memref<2x7xf32, #tpu.memory_space<vmem>>, vector<1x7xf32>
    %123 = vector.broadcast %122 : vector<1x7xf32> to vector<8x7xf32>
    %124 = arith.addf %121, %123 : vector<8x7xf32>
    %125 = tpu.concatenate %124, %50, %58 in 1 : vector<8x7xf32>, vector<8x1xf32>, vector<8x1xf32> -> vector<8x9xf32>
    %c0_77 = arith.constant 0 : index
    %c0_78 = arith.constant 0 : index
    %126 = vector.load %arg28[%c0_77, %c0_78] : memref<8x9xf32, #tpu.memory_space<vmem>>, vector<8x9xf32>
    tpu.vector_store %arg28[%c0_77, %c0_78], %125 {strides = array<i32>} : memref<8x9xf32, #tpu.memory_space<vmem>>, vector<8x9xf32>,
    return
  }
  func.func @transform_0(%arg0: i32) -> (i32, i32) {
    %c0_i32 = arith.constant 0 : i32
    %c0_i32_0 = arith.constant 0 : i32
    return %arg0, %c0_i32 : i32, i32
  }
  func.func @transform_1(%arg0: i32) -> (i32, i32) {
    %c0_i32 = arith.constant 0 : i32
    %c0_i32_0 = arith.constant 0 : i32
    %c0_i32_1 = arith.constant 0 : i32
    return %c0_i32, %c0_i32_0 : i32, i32
  }
  func.func @transform_2(%arg0: i32) -> (i32, i32) {
    %c0_i32 = arith.constant 0 : i32
    %c0_i32_0 = arith.constant 0 : i32
    %c0_i32_1 = arith.constant 0 : i32
    return %c0_i32, %c0_i32_0 : i32, i32
  }
  func.func @transform_3(%arg0: i32) -> (i32, i32) {
    %c0_i32 = arith.constant 0 : i32
    %c0_i32_0 = arith.constant 0 : i32
    %c0_i32_1 = arith.constant 0 : i32
    return %c0_i32, %c0_i32_0 : i32, i32
  }
  func.func @transform_4(%arg0: i32) -> (i32, i32) {
    %c0_i32 = arith.constant 0 : i32
    %c0_i32_0 = arith.constant 0 : i32
    %c0_i32_1 = arith.constant 0 : i32
    return %c0_i32, %c0_i32_0 : i32, i32
  }
  func.func @transform_5(%arg0: i32) -> (i32, i32) {
    %c0_i32 = arith.constant 0 : i32
    %c0_i32_0 = arith.constant 0 : i32
    %c0_i32_1 = arith.constant 0 : i32
    return %c0_i32, %c0_i32_0 : i32, i32
  }
  func.func @transform_6(%arg0: i32) -> (i32, i32) {
    %c0_i32 = arith.constant 0 : i32
    %c0_i32_0 = arith.constant 0 : i32
    %c0_i32_1 = arith.constant 0 : i32
    return %c0_i32, %c0_i32_0 : i32, i32
  }
  func.func @transform_7(%arg0: i32) -> (i32, i32) {
    %c0_i32 = arith.constant 0 : i32
    %c0_i32_0 = arith.constant 0 : i32
    %c0_i32_1 = arith.constant 0 : i32
    return %c0_i32, %c0_i32_0 : i32, i32
  }
  func.func @transform_8(%arg0: i32) -> (i32, i32) {
    %c0_i32 = arith.constant 0 : i32
    %c0_i32_0 = arith.constant 0 : i32
    %c0_i32_1 = arith.constant 0 : i32
    return %c0_i32, %c0_i32_0 : i32, i32
  }
  func.func @transform_9(%arg0: i32) -> (i32, i32) {
    %c0_i32 = arith.constant 0 : i32
    %c0_i32_0 = arith.constant 0 : i32
    %c0_i32_1 = arith.constant 0 : i32
    return %c0_i32, %c0_i32_0 : i32, i32
  }
  func.func @transform_10(%arg0: i32) -> (i32, i32) {
    %c0_i32 = arith.constant 0 : i32
    %c0_i32_0 = arith.constant 0 : i32
    %c0_i32_1 = arith.constant 0 : i32
    return %c0_i32, %c0_i32_0 : i32, i32
  }
  func.func @transform_11(%arg0: i32) -> (i32, i32) {
    %c0_i32 = arith.constant 0 : i32
    %c0_i32_0 = arith.constant 0 : i32
    %c0_i32_1 = arith.constant 0 : i32
    return %c0_i32, %c0_i32_0 : i32, i32
  }
  func.func @transform_12(%arg0: i32) -> (i32, i32) {
    %c0_i32 = arith.constant 0 : i32
    %c0_i32_0 = arith.constant 0 : i32
    %c0_i32_1 = arith.constant 0 : i32
    return %c0_i32, %c0_i32_0 : i32, i32
  }
  func.func @transform_13(%arg0: i32) -> (i32, i32) {
    %c0_i32 = arith.constant 0 : i32
    %c0_i32_0 = arith.constant 0 : i32
    %c0_i32_1 = arith.constant 0 : i32
    return %c0_i32, %c0_i32_0 : i32, i32
  }
  func.func @transform_14(%arg0: i32) -> (i32, i32) {
    %c0_i32 = arith.constant 0 : i32
    %c0_i32_0 = arith.constant 0 : i32
    %c0_i32_1 = arith.constant 0 : i32
    return %c0_i32, %c0_i32_0 : i32, i32
  }
  func.func @transform_15(%arg0: i32) -> (i32, i32) {
    %c0_i32 = arith.constant 0 : i32
    %c0_i32_0 = arith.constant 0 : i32
    %c0_i32_1 = arith.constant 0 : i32
    return %c0_i32, %c0_i32_0 : i32, i32
  }
  func.func @transform_16(%arg0: i32) -> (i32, i32) {
    %c0_i32 = arith.constant 0 : i32
    %c0_i32_0 = arith.constant 0 : i32
    %c0_i32_1 = arith.constant 0 : i32
    return %c0_i32, %c0_i32_0 : i32, i32
  }
  func.func @transform_17(%arg0: i32) -> (i32, i32) {
    %c0_i32 = arith.constant 0 : i32
    %c0_i32_0 = arith.constant 0 : i32
    %c0_i32_1 = arith.constant 0 : i32
    return %c0_i32, %c0_i32_0 : i32, i32
  }
  func.func @transform_18(%arg0: i32) -> (i32, i32) {
    %c0_i32 = arith.constant 0 : i32
    %c0_i32_0 = arith.constant 0 : i32
    %c0_i32_1 = arith.constant 0 : i32
    return %c0_i32, %c0_i32_0 : i32, i32
  }
  func.func @transform_19(%arg0: i32) -> (i32, i32) {
    %c0_i32 = arith.constant 0 : i32
    %c0_i32_0 = arith.constant 0 : i32
    %c0_i32_1 = arith.constant 0 : i32
    return %c0_i32, %c0_i32_0 : i32, i32
  }
  func.func @transform_20(%arg0: i32) -> (i32, i32) {
    %c0_i32 = arith.constant 0 : i32
    %c0_i32_0 = arith.constant 0 : i32
    %c0_i32_1 = arith.constant 0 : i32
    return %c0_i32, %c0_i32_0 : i32, i32
  }
  func.func @transform_21(%arg0: i32) -> (i32, i32) {
    %c0_i32 = arith.constant 0 : i32
    %c0_i32_0 = arith.constant 0 : i32
    %c0_i32_1 = arith.constant 0 : i32
    return %c0_i32, %c0_i32_0 : i32, i32
  }
  func.func @transform_22(%arg0: i32) -> (i32, i32) {
    %c0_i32 = arith.constant 0 : i32
    %c0_i32_0 = arith.constant 0 : i32
    %c0_i32_1 = arith.constant 0 : i32
    return %c0_i32, %c0_i32_0 : i32, i32
  }
  func.func @transform_23(%arg0: i32) -> (i32, i32) {
    %c0_i32 = arith.constant 0 : i32
    %c0_i32_0 = arith.constant 0 : i32
    %c0_i32_1 = arith.constant 0 : i32
    return %c0_i32, %c0_i32_0 : i32, i32
  }
  func.func @transform_24(%arg0: i32) -> (i32, i32) {
    %c0_i32 = arith.constant 0 : i32
    %c0_i32_0 = arith.constant 0 : i32
    %c0_i32_1 = arith.constant 0 : i32
    return %c0_i32, %c0_i32_0 : i32, i32
  }
  func.func @transform_25(%arg0: i32) -> (i32, i32) {
    %c0_i32 = arith.constant 0 : i32
    %c0_i32_0 = arith.constant 0 : i32
    %c0_i32_1 = arith.constant 0 : i32
    return %c0_i32, %c0_i32_0 : i32, i32
  }
  func.func @transform_26(%arg0: i32) -> (i32, i32) {
    %c0_i32 = arith.constant 0 : i32
    %c0_i32_0 = arith.constant 0 : i32
    %c0_i32_1 = arith.constant 0 : i32
    return %c0_i32, %c0_i32_0 : i32, i32
  }
  func.func @transform_27(%arg0: i32) -> (i32, i32) {
    %c0_i32 = arith.constant 0 : i32
    %c0_i32_0 = arith.constant 0 : i32
    return %arg0, %c0_i32 : i32, i32
  }
}

</mosaic_0001>

<bundles_post_ra>
// kernel: cvae_forward_train.1
= control target key start
LH: loop header
LB: loop body
LE: loop exit
PB: predicated region body
PF: predicated region fallthrough
CT: control target
= control target key end

     0   :  { %s4698_s0 = inlined_call_operand.vmem [shape: f32[8,16], index: 0, kind: input, shape index: {}]   ;;  %s4699_s1 = inlined_call_operand.vmem [shape: f32[2,7], index: 1, kind: input, shape index: {}]   ;;  %s4700_s2 = inlined_call_operand.hbm [shape: bf16[16,256], index: 2, kind: input, shape index: {}]   ;;  %s4701_s3 = inlined_call_operand.hbm [shape: f32[1,256], index: 3, kind: input, shape index: {}]   ;;  %s4702_s4 = inlined_call_operand.hbm [shape: bf16[256,256], index: 4, kind: input, shape index: {}]   ;;  %s4703_s5 = inlined_call_operand.hbm [shape: f32[1,256], index: 5, kind: input, shape index: {}]   ;;  %s4704_s6 = inlined_call_operand.hbm [shape: bf16[256,256], index: 6, kind: input, shape index: {}]   ;;  %s4705_s7 = inlined_call_operand.hbm [shape: f32[1,256], index: 7, kind: input, shape index: {}]   ;;  %s4706_s8 = inlined_call_operand.hbm [shape: bf16[256,256], index: 8, kind: input, shape index: {}]   ;;  %s4707_s9 = inlined_call_operand.hbm [shape: f32[1,256], index: 9, kind: input, shape index: {}]   ;;  %s4708_s10 = inlined_call_operand.hbm [shape: bf16[256,256], index: 10, kind: input, shape index: {}]   ;;  %s4709_s11 = inlined_call_operand.hbm [shape: f32[1,256], index: 11, kind: input, shape index: {}]   ;;  %s4710_s12 = inlined_call_operand.hbm [shape: f32[2,256], index: 12, kind: input, shape index: {}]   ;;  %s4711_s13 = inlined_call_operand.vmem [shape: f32[1,2], index: 13, kind: input, shape index: {}]   ;;  %s4712_s14 = inlined_call_operand.hbm [shape: bf16[1,256], index: 14, kind: input, shape index: {}]   ;;  %s4713_s15 = inlined_call_operand.hbm [shape: bf16[16,256], index: 15, kind: input, shape index: {}]   ;;  %s4714_s16 = inlined_call_operand.hbm [shape: f32[1,256], index: 16, kind: input, shape index: {}]   ;;  %s4715_s17 = inlined_call_operand.hbm [shape: bf16[256,256], index: 17, kind: input, shape index: {}]   ;;  %s4716_s18 = inlined_call_operand.hbm [shape: f32[1,256], index: 18, kind: input, shape index: {}]   ;;  %s4717_s19 = inlined_call_operand.hbm [shape: bf16[256,256], index: 19, kind: input, shape index: {}]   ;;  %s4718_s20 = inlined_call_operand.hbm [shape: f32[1,256], index: 20, kind: input, shape index: {}]   ;;  %s4719_s21 = inlined_call_operand.hbm [shape: bf16[256,256], index: 21, kind: input, shape index: {}]   ;;  %s4720_s22 = inlined_call_operand.hbm [shape: f32[1,256], index: 22, kind: input, shape index: {}]   ;;  %s4721_s23 = inlined_call_operand.vmem [shape: bf16[256,256], index: 23, kind: input, shape index: {}]   ;;  %s4722_s24 = inlined_call_operand.hbm [shape: f32[1,256], index: 24, kind: input, shape index: {}]   ;;  %s4723_s25 = inlined_call_operand.vmem [shape: bf16[256,7], index: 25, kind: input, shape index: {}]   ;;  %s4724_s26 = inlined_call_operand.vmem [shape: f32[1,7], index: 26, kind: input, shape index: {}]   ;;  %s4725_s27 = inlined_call_operand.vmem [shape: f32[8,9], index: 27, kind: output, shape index: {}]  }
   0x1   :  { %4738 = sst [smem:[#allocation45_spill]] %s4698_s0 }
   0x2   :  { %4739 = sst [smem:[#allocation46_spill]] %s4699_s1 }
   0x3   :  { %4740 = sst [smem:[#allocation47_spill]] %s4700_s2 }
   0x4   :  { %4741 = sst [smem:[#allocation48_spill]] %s4701_s3 }
   0x5   :  { %4742 = sst [smem:[#allocation49_spill]] %s4702_s4 }
   0x6   :  { %4743 = sst [smem:[#allocation50_spill]] %s4703_s5 }
   0x7   :  { %4744 = sst [smem:[#allocation51_spill]] %s4704_s6 }
   0x8   :  { %4745 = sst [smem:[#allocation52_spill]] %s4705_s7 }
   0x9   :  { %4746 = sst [smem:[#allocation53_spill]] %s4706_s8 }
   0xa   :  { %4747 = sst [smem:[#allocation54_spill]] %s4707_s9 }
   0xb   :  { %4748 = sst [smem:[#allocation55_spill]] %s4708_s10 }
   0xc   :  { %4749 = sst [smem:[#allocation56_spill]] %s4709_s11 }
   0xd   :  { %4750 = sst [smem:[#allocation57_spill]] %s4725_s27 }
   0xe   :  { %32 = vsyncpa [#allocation3], 0 }
   0xf   :  { %33 = vsyncpa [#allocation5], 0 }
  0x10   :  { %34 = vsyncpa [#allocation8], 0 }
  0x11   :  { %35 = vsyncpa [#allocation11], 0 }
  0x12   :  { %36 = vsyncpa [#allocation14], 0 }
  0x13   :  { %37 = vsyncpa [#allocation17], 0 }
  0x14   :  { %38 = vsyncpa [#allocation20], 0 }
  0x15   :  { %39 = vsyncpa [#allocation23], 0 }
  0x16   :  { %40 = vsyncpa [#allocation26], 0 }
  0x17   :  { %41 = vsyncpa [#allocation29], 0 }
  0x18   :  { %42 = vsyncpa [#allocation32], 0  ;;  %s4029_s7 = smov [#allocation4]   ;;  %s4030_s8 = smov [#allocation7]  }
  0x19   :  { %s65_s4 = sshll.u32 %s4029_s7, 4  ;;  %s87_s30 = sshll.u32 %s4030_s8, 4  ;;  %s66_s4 = int_to_ptr.vmem [resolvable:$true] %s65_s4  ;;  %s88_s30 = int_to_ptr.vmem [resolvable:$true] %s87_s30 }
  0x1a   :  { %s4751_s28 = sld [smem:[#allocation48_spill]] }
  0x20   :  { %s3545_s0 = scalar_lea.hbm %s4751_s28, 32 }
  0x21   :  { %p3546_p0 = scmp.ne.s32.totalorder %s4751_s28, %s3545_s0  ;;  %p3549_p1 = scmp.lt.u32.totalorder %s3545_s0, %s4751_s28 }
  0x23   :  { %p3551_p2 = pnand %p3549_p1, %p3546_p0 }
  0x25   :  { %3554 = shalt.err (!%p3551_p2)
}
  0x26   :  { %s3555_s11 = scalar_lea.vmem %s66_s4, 32  ;;  %p3560_p4 = scmp.lt.s32.totalorder %s66_s4, %s66_s4 }
  0x27   :  { %p3556_p3 = scmp.ne.s32.totalorder %s66_s4, %s3555_s11  ;;  %p3561_p5 = scmp.lt.s32.totalorder %s3555_s11, %s3555_s11 }
  0x29   :  { %p3562_p6 = por %p3561_p5, %p3560_p4 }
  0x2b   :  { %p3563_p7 = pnand %p3562_p6, %p3556_p3 }
  0x2d   :  { %3566 = shalt.err (!%p3563_p7)
}
  0x2e   :  { %68 = dma.hbm_to_vmem [thread:$0]  %s4751_s28, 32, %s66_s4, [#allocation5]  }
  0x2f   :  { %s4752_s9 = sld [smem:[#allocation50_spill]] }
  0x35   :  { %s3567_s5 = scalar_lea.hbm %s4752_s9, 32 }
  0x36   :  { %p3568_p8 = scmp.ne.s32.totalorder %s4752_s9, %s3567_s5  ;;  %p3571_p9 = scmp.lt.u32.totalorder %s3567_s5, %s4752_s9 }
  0x38   :  { %p3573_p10 = pnand %p3571_p9, %p3568_p8 }
  0x3a   :  { %3576 = shalt.err (!%p3573_p10)
}
  0x3b   :  { %s3577_s6 = scalar_lea.vmem %s88_s30, 32  ;;  %p3582_p12 = scmp.lt.s32.totalorder %s88_s30, %s88_s30 }
  0x3c   :  { %p3578_p11 = scmp.ne.s32.totalorder %s88_s30, %s3577_s6  ;;  %p3583_p13 = scmp.lt.s32.totalorder %s3577_s6, %s3577_s6 }
  0x3e   :  { %p3584_p0 = por %p3583_p13, %p3582_p12 }
  0x40   :  { %p3585_p1 = pnand %p3584_p0, %p3578_p11 }
  0x42   :  { %3588 = shalt.err (!%p3585_p1)
}
  0x43   :  { %90 = dma.hbm_to_vmem [thread:$0]  %s4752_s9, 32, %s88_s30, [#allocation8]  }
  0x44   :  { %s4031_s11 = smov [#allocation10]   ;;  %s4032_s3 = smov [#allocation13]  }
  0x45   :  { %s109_s2 = sshll.u32 %s4031_s11, 4  ;;  %s131_s7 = sshll.u32 %s4032_s3, 4  ;;  %s110_s2 = int_to_ptr.vmem [resolvable:$true] %s109_s2  ;;  %s132_s7 = int_to_ptr.vmem [resolvable:$true] %s131_s7 }
  0x46   :  { %s4753_s10 = sld [smem:[#allocation52_spill]] }
  0x4c   :  { %s3589_s29 = scalar_lea.hbm %s4753_s10, 32 }
  0x4d   :  { %p3590_p2 = scmp.ne.s32.totalorder %s4753_s10, %s3589_s29  ;;  %p3593_p3 = scmp.lt.u32.totalorder %s3589_s29, %s4753_s10 }
  0x4f   :  { %p3595_p4 = pnand %p3593_p3, %p3590_p2 }
  0x51   :  { %3598 = shalt.err (!%p3595_p4)
}
  0x52   :  { %s3599_s30 = scalar_lea.vmem %s110_s2, 32  ;;  %p3604_p6 = scmp.lt.s32.totalorder %s110_s2, %s110_s2 }
  0x53   :  { %p3600_p5 = scmp.ne.s32.totalorder %s110_s2, %s3599_s30  ;;  %p3605_p7 = scmp.lt.s32.totalorder %s3599_s30, %s3599_s30 }
  0x55   :  { %p3606_p8 = por %p3605_p7, %p3604_p6 }
  0x57   :  { %p3607_p9 = pnand %p3606_p8, %p3600_p5 }
  0x59   :  { %3610 = shalt.err (!%p3607_p9)
}
  0x5a   :  { %112 = dma.hbm_to_vmem [thread:$0]  %s4753_s10, 32, %s110_s2, [#allocation11]  }
  0x5b   :  { %s4754_s3 = sld [smem:[#allocation54_spill]] }
  0x61   :  { %s3611_s8 = scalar_lea.hbm %s4754_s3, 32 }
  0x62   :  { %p3612_p10 = scmp.ne.s32.totalorder %s4754_s3, %s3611_s8  ;;  %p3615_p11 = scmp.lt.u32.totalorder %s3611_s8, %s4754_s3 }
  0x64   :  { %p3617_p12 = pnand %p3615_p11, %p3612_p10 }
  0x66   :  { %3620 = shalt.err (!%p3617_p12)
}
  0x67   :  { %s3621_s1 = scalar_lea.vmem %s132_s7, 32  ;;  %p3626_p0 = scmp.lt.s32.totalorder %s132_s7, %s132_s7 }
  0x68   :  { %p3622_p13 = scmp.ne.s32.totalorder %s132_s7, %s3621_s1  ;;  %p3627_p1 = scmp.lt.s32.totalorder %s3621_s1, %s3621_s1 }
  0x6a   :  { %p3628_p2 = por %p3627_p1, %p3626_p0 }
  0x6c   :  { %p3629_p3 = pnand %p3628_p2, %p3622_p13 }
  0x6e   :  { %3632 = shalt.err (!%p3629_p3)
}
  0x6f   :  { %134 = dma.hbm_to_vmem [thread:$0]  %s4754_s3, 32, %s132_s7, [#allocation14]  }
  0x70   :  { %s4033_s6 = smov [#allocation16]   ;;  %s4034_s9 = smov [#allocation19]  }
  0x71   :  { %s153_s30 = sshll.u32 %s4033_s6, 4  ;;  %s175_s4 = sshll.u32 %s4034_s9, 4  ;;  %s154_s30 = int_to_ptr.vmem [resolvable:$true] %s153_s30  ;;  %s176_s4 = int_to_ptr.vmem [resolvable:$true] %s175_s4 }
  0x72   :  { %s4755_s8 = sld [smem:[#allocation56_spill]] }
  0x78   :  { %s3633_s5 = scalar_lea.hbm %s4755_s8, 32 }
  0x79   :  { %p3634_p4 = scmp.ne.s32.totalorder %s4755_s8, %s3633_s5  ;;  %p3637_p5 = scmp.lt.u32.totalorder %s3633_s5, %s4755_s8 }
  0x7b   :  { %p3639_p6 = pnand %p3637_p5, %p3634_p4 }
  0x7d   :  { %3642 = shalt.err (!%p3639_p6)
}
  0x7e   :  { %s3643_s7 = scalar_lea.vmem %s154_s30, 32  ;;  %p3648_p8 = scmp.lt.s32.totalorder %s154_s30, %s154_s30 }
  0x7f   :  { %p3644_p7 = scmp.ne.s32.totalorder %s154_s30, %s3643_s7  ;;  %p3649_p9 = scmp.lt.s32.totalorder %s3643_s7, %s3643_s7 }
  0x81   :  { %p3650_p10 = por %p3649_p9, %p3648_p8 }
  0x83   :  { %p3651_p11 = pnand %p3650_p10, %p3644_p7 }
  0x85   :  { %3654 = shalt.err (!%p3651_p11)
}
  0x86   :  { %156 = dma.hbm_to_vmem [thread:$0]  %s4755_s8, 32, %s154_s30, [#allocation17]  }
  0x87   :  { %s3655_s9 = scalar_lea.hbm %s4712_s14, 32 }
  0x88   :  { %p3656_p12 = scmp.ne.s32.totalorder %s4712_s14, %s3655_s9  ;;  %p3659_p13 = scmp.lt.u32.totalorder %s3655_s9, %s4712_s14 }
  0x8a   :  { %p3661_p0 = pnand %p3659_p13, %p3656_p12 }
  0x8c   :  { %3664 = shalt.err (!%p3661_p0)
}
  0x8d   :  { %s3665_s29 = scalar_lea.vmem %s176_s4, 32  ;;  %p3670_p2 = scmp.lt.s32.totalorder %s176_s4, %s176_s4 }
  0x8e   :  { %p3666_p1 = scmp.ne.s32.totalorder %s176_s4, %s3665_s29  ;;  %p3671_p3 = scmp.lt.s32.totalorder %s3665_s29, %s3665_s29 }
  0x90   :  { %p3672_p4 = por %p3671_p3, %p3670_p2 }
  0x92   :  { %p3673_p5 = pnand %p3672_p4, %p3666_p1 }
  0x94   :  { %3676 = shalt.err (!%p3673_p5)
}
  0x95   :  { %178 = dma.hbm_to_vmem [thread:$0]  %s4712_s14, 32, %s176_s4, [#allocation20]  }
  0x96   :  { %s4035_s0 = smov [#allocation22]   ;;  %s4036_s7 = smov [#allocation25]  }
  0x97   :  { %s197_s1 = sshll.u32 %s4035_s0, 4  ;;  %s219_s3 = sshll.u32 %s4036_s7, 4  ;;  %s198_s1 = int_to_ptr.vmem [resolvable:$true] %s197_s1  ;;  %s220_s3 = int_to_ptr.vmem [resolvable:$true] %s219_s3 }
  0x98   :  { %s3677_s6 = scalar_lea.hbm %s4714_s16, 32 }
  0x99   :  { %p3678_p6 = scmp.ne.s32.totalorder %s4714_s16, %s3677_s6  ;;  %p3681_p7 = scmp.lt.u32.totalorder %s3677_s6, %s4714_s16 }
  0x9b   :  { %p3683_p8 = pnand %p3681_p7, %p3678_p6 }
  0x9d   :  { %3686 = shalt.err (!%p3683_p8)
}
  0x9e   :  { %s3687_s14 = scalar_lea.vmem %s198_s1, 32  ;;  %p3692_p10 = scmp.lt.s32.totalorder %s198_s1, %s198_s1 }
  0x9f   :  { %p3688_p9 = scmp.ne.s32.totalorder %s198_s1, %s3687_s14  ;;  %p3693_p11 = scmp.lt.s32.totalorder %s3687_s14, %s3687_s14 }
  0xa1   :  { %p3694_p12 = por %p3693_p11, %p3692_p10 }
  0xa3   :  { %p3695_p13 = pnand %p3694_p12, %p3688_p9 }
  0xa5   :  { %3698 = shalt.err (!%p3695_p13)
}
  0xa6   :  { %200 = dma.hbm_to_vmem [thread:$0]  %s4714_s16, 32, %s198_s1, [#allocation23]  }
  0xa7   :  { %s3699_s8 = scalar_lea.hbm %s4716_s18, 32 }
  0xa8   :  { %p3700_p0 = scmp.ne.s32.totalorder %s4716_s18, %s3699_s8  ;;  %p3703_p1 = scmp.lt.u32.totalorder %s3699_s8, %s4716_s18 }
  0xaa   :  { %p3705_p2 = pnand %p3703_p1, %p3700_p0 }
  0xac   :  { %3708 = shalt.err (!%p3705_p2)
}
  0xad   :  { %s3709_s6 = scalar_lea.vmem %s220_s3, 32  ;;  %p3714_p4 = scmp.lt.s32.totalorder %s220_s3, %s220_s3 }
  0xae   :  { %p3710_p3 = scmp.ne.s32.totalorder %s220_s3, %s3709_s6  ;;  %p3715_p5 = scmp.lt.s32.totalorder %s3709_s6, %s3709_s6 }
  0xb0   :  { %p3716_p6 = por %p3715_p5, %p3714_p4 }
  0xb2   :  { %p3717_p7 = pnand %p3716_p6, %p3710_p3 }
  0xb4   :  { %3720 = shalt.err (!%p3717_p7)
}
  0xb5   :  { %222 = dma.hbm_to_vmem [thread:$0]  %s4716_s18, 32, %s220_s3, [#allocation26]  }
  0xb6   :  { %s4037_s9 = smov [#allocation28]   ;;  %s4038_s11 = smov [#allocation31]  }
  0xb7   :  { %s241_s28 = sshll.u32 %s4037_s9, 4  ;;  %s263_s5 = sshll.u32 %s4038_s11, 4  ;;  %s242_s28 = int_to_ptr.vmem [resolvable:$true] %s241_s28  ;;  %s264_s5 = int_to_ptr.vmem [resolvable:$true] %s263_s5 }
  0xb8   :  { %s3721_s27 = scalar_lea.hbm %s4718_s20, 32 }
  0xb9   :  { %p3722_p8 = scmp.ne.s32.totalorder %s4718_s20, %s3721_s27  ;;  %p3725_p9 = scmp.lt.u32.totalorder %s3721_s27, %s4718_s20 }
  0xbb   :  { %p3727_p10 = pnand %p3725_p9, %p3722_p8 }
  0xbd   :  { %3730 = shalt.err (!%p3727_p10)
}
  0xbe   :  { %s3731_s18 = scalar_lea.vmem %s242_s28, 32  ;;  %p3736_p12 = scmp.lt.s32.totalorder %s242_s28, %s242_s28 }
  0xbf   :  { %p3732_p11 = scmp.ne.s32.totalorder %s242_s28, %s3731_s18  ;;  %p3737_p13 = scmp.lt.s32.totalorder %s3731_s18, %s3731_s18 }
  0xc1   :  { %p3738_p0 = por %p3737_p13, %p3736_p12 }
  0xc3   :  { %p3739_p1 = pnand %p3738_p0, %p3732_p11 }
  0xc5   :  { %3742 = shalt.err (!%p3739_p1)
}
  0xc6   :  { %244 = dma.hbm_to_vmem [thread:$0]  %s4718_s20, 32, %s242_s28, [#allocation29]  }
  0xc7   :  { %s3743_s6 = scalar_lea.hbm %s4720_s22, 32 }
  0xc8   :  { %p3744_p2 = scmp.ne.s32.totalorder %s4720_s22, %s3743_s6  ;;  %p3747_p3 = scmp.lt.u32.totalorder %s3743_s6, %s4720_s22 }
  0xca   :  { %p3749_p4 = pnand %p3747_p3, %p3744_p2 }
  0xcc   :  { %3752 = shalt.err (!%p3749_p4)
}
  0xcd   :  { %s3753_s14 = scalar_lea.vmem %s264_s5, 32  ;;  %p3758_p6 = scmp.lt.s32.totalorder %s264_s5, %s264_s5 }
  0xce   :  { %p3754_p5 = scmp.ne.s32.totalorder %s264_s5, %s3753_s14  ;;  %p3759_p7 = scmp.lt.s32.totalorder %s3753_s14, %s3753_s14 }
  0xd0   :  { %p3760_p8 = por %p3759_p7, %p3758_p6 }
  0xd2   :  { %p3761_p9 = pnand %p3760_p8, %p3754_p5 }
  0xd4   :  { %3764 = shalt.err (!%p3761_p9)
}
  0xd5   :  { %266 = dma.hbm_to_vmem [thread:$0]  %s4720_s22, 32, %s264_s5, [#allocation32]  }
  0xd6   :  { %s4039_s4 = smov [#allocation2]   ;;  %s4756_s8 = sld [smem:[#allocation47_spill]] }
  0xd7   :  { %s52_s27 = sshll.u32 %s4039_s4, 4  ;;  %s53_s27 = int_to_ptr.vmem [resolvable:$true] %s52_s27 }
  0xdc   :  { %s3765_s0 = scalar_lea.hbm %s4756_s8, 256 }
  0xdd   :  { %p3766_p10 = scmp.ne.s32.totalorder %s4756_s8, %s3765_s0  ;;  %p3769_p11 = scmp.lt.u32.totalorder %s3765_s0, %s4756_s8 }
  0xdf   :  { %p3771_p12 = pnand %p3769_p11, %p3766_p10 }
  0xe1   :  { %3774 = shalt.err (!%p3771_p12)
}
  0xe2   :  { %s3775_s10 = scalar_lea.vmem %s53_s27, 256  ;;  %p3780_p0 = scmp.lt.s32.totalorder %s53_s27, %s53_s27 }
  0xe3   :  { %p3776_p13 = scmp.ne.s32.totalorder %s53_s27, %s3775_s10  ;;  %p3781_p1 = scmp.lt.s32.totalorder %s3775_s10, %s3775_s10 }
  0xe5   :  { %p3782_p2 = por %p3781_p1, %p3780_p0 }
  0xe7   :  { %p3783_p3 = pnand %p3782_p2, %p3776_p13 }
  0xe9   :  { %3786 = shalt.err (!%p3783_p3)
}
  0xea   :  { %s4040_s22 = smov 128   ;;  %s4041_s5 = smov 8  }
  0xeb   :  { %58 = dma.hbm_to_vmem [thread:$0]  %s4756_s8, 256, %s53_s27, [#allocation3], %s4040_s22, %s4040_s22, %s4041_s5  }
  0xec   :  { %s4042_s1 = smov [#allocation6]   ;;  %s4043_s11 = smov [#allocation9]  }
  0xed   :  { %s74_s9 = sshll.u32 %s4042_s1, 4  ;;  %s96_s14 = sshll.u32 %s4043_s11, 4  ;;  %s75_s9 = int_to_ptr.vmem [resolvable:$true] %s74_s9  ;;  %s97_s14 = int_to_ptr.vmem [resolvable:$true] %s96_s14 }
  0xee   :  { %s4757_s4 = sld [smem:[#allocation49_spill]] }
  0xf4   :  { %s3787_s29 = scalar_lea.hbm %s4757_s4, 4096 }
  0xf5   :  { %p3788_p4 = scmp.ne.s32.totalorder %s4757_s4, %s3787_s29  ;;  %p3791_p5 = scmp.lt.u32.totalorder %s3787_s29, %s4757_s4 }
  0xf7   :  { %p3793_p6 = pnand %p3791_p5, %p3788_p4 }
  0xf9   :  { %3796 = shalt.err (!%p3793_p6)
}
  0xfa   :  { %s3797_s27 = scalar_lea.vmem %s75_s9, 4096  ;;  %p3802_p8 = scmp.lt.s32.totalorder %s75_s9, %s75_s9 }
  0xfb   :  { %p3798_p7 = scmp.ne.s32.totalorder %s75_s9, %s3797_s27  ;;  %p3803_p9 = scmp.lt.s32.totalorder %s3797_s27, %s3797_s27 }
  0xfd   :  { %p3804_p10 = por %p3803_p9, %p3802_p8 }
  0xff   :  { %p3805_p11 = pnand %p3804_p10, %p3798_p7 }
 0x101   :  { %3808 = shalt.err (!%p3805_p11)
}
 0x102   :  { %80 = dma.hbm_to_vmem [thread:$0]  %s4757_s4, 4096, %s75_s9, [#allocation5], %s4040_s22, %s4040_s22, %s4041_s5  }
 0x103   :  { %s4758_s6 = sld [smem:[#allocation51_spill]] }
 0x109   :  { %s3809_s16 = scalar_lea.hbm %s4758_s6, 4096 }
 0x10a   :  { %p3810_p12 = scmp.ne.s32.totalorder %s4758_s6, %s3809_s16  ;;  %p3813_p13 = scmp.lt.u32.totalorder %s3809_s16, %s4758_s6 }
 0x10c   :  { %p3815_p0 = pnand %p3813_p13, %p3810_p12 }
 0x10e   :  { %3818 = shalt.err (!%p3815_p0)
}
 0x10f   :  { %s3819_s29 = scalar_lea.vmem %s97_s14, 4096  ;;  %p3824_p2 = scmp.lt.s32.totalorder %s97_s14, %s97_s14 }
 0x110   :  { %p3820_p1 = scmp.ne.s32.totalorder %s97_s14, %s3819_s29  ;;  %p3825_p3 = scmp.lt.s32.totalorder %s3819_s29, %s3819_s29 }
 0x112   :  { %p3826_p4 = por %p3825_p3, %p3824_p2 }
 0x114   :  { %p3827_p5 = pnand %p3826_p4, %p3820_p1 }
 0x116   :  { %3830 = shalt.err (!%p3827_p5)
}
 0x117   :  { %102 = dma.hbm_to_vmem [thread:$0]  %s4758_s6, 4096, %s97_s14, [#allocation8], %s4040_s22, %s4040_s22, %s4041_s5  }
 0x118   :  { %s4044_s30 = smov [#allocation12]   ;;  %s4045_s18 = smov [#allocation15]  }
 0x119   :  { %s118_s0 = sshll.u32 %s4044_s30, 4  ;;  %s140_s3 = sshll.u32 %s4045_s18, 4  ;;  %s119_s0 = int_to_ptr.vmem [resolvable:$true] %s118_s0  ;;  %s141_s3 = int_to_ptr.vmem [resolvable:$true] %s140_s3 }
 0x11a   :  { %s4759_s7 = sld [smem:[#allocation53_spill]] }
 0x120   :  { %s3831_s2 = scalar_lea.hbm %s4759_s7, 4096 }
 0x121   :  { %p3832_p6 = scmp.ne.s32.totalorder %s4759_s7, %s3831_s2  ;;  %p3835_p7 = scmp.lt.u32.totalorder %s3831_s2, %s4759_s7 }
 0x123   :  { %p3837_p8 = pnand %p3835_p7, %p3832_p6 }
 0x125   :  { %3840 = shalt.err (!%p3837_p8)
}
 0x126   :  { %s3841_s14 = scalar_lea.vmem %s119_s0, 4096  ;;  %p3846_p10 = scmp.lt.s32.totalorder %s119_s0, %s119_s0 }
 0x127   :  { %p3842_p9 = scmp.ne.s32.totalorder %s119_s0, %s3841_s14  ;;  %p3847_p11 = scmp.lt.s32.totalorder %s3841_s14, %s3841_s14 }
 0x129   :  { %p3848_p12 = por %p3847_p11, %p3846_p10 }
 0x12b   :  { %p3849_p13 = pnand %p3848_p12, %p3842_p9 }
 0x12d   :  { %3852 = shalt.err (!%p3849_p13)
}
 0x12e   :  { %124 = dma.hbm_to_vmem [thread:$0]  %s4759_s7, 4096, %s119_s0, [#allocation11], %s4040_s22, %s4040_s22, %s4041_s5  }
 0x12f   :  { %s4760_s9 = sld [smem:[#allocation55_spill]] }
 0x135   :  { %s3853_s4 = scalar_lea.hbm %s4760_s9, 4096 }
 0x136   :  { %p3854_p0 = scmp.ne.s32.totalorder %s4760_s9, %s3853_s4  ;;  %p3857_p1 = scmp.lt.u32.totalorder %s3853_s4, %s4760_s9 }
 0x138   :  { %p3859_p2 = pnand %p3857_p1, %p3854_p0 }
 0x13a   :  { %3862 = shalt.err (!%p3859_p2)
}
 0x13b   :  { %s3863_s2 = scalar_lea.vmem %s141_s3, 4096  ;;  %p3868_p4 = scmp.lt.s32.totalorder %s141_s3, %s141_s3 }
 0x13c   :  { %p3864_p3 = scmp.ne.s32.totalorder %s141_s3, %s3863_s2  ;;  %p3869_p5 = scmp.lt.s32.totalorder %s3863_s2, %s3863_s2 }
 0x13e   :  { %p3870_p6 = por %p3869_p5, %p3868_p4 }
 0x140   :  { %p3871_p7 = pnand %p3870_p6, %p3864_p3 }
 0x142   :  { %3874 = shalt.err (!%p3871_p7)
}
 0x143   :  { %146 = dma.hbm_to_vmem [thread:$0]  %s4760_s9, 4096, %s141_s3, [#allocation14], %s4040_s22, %s4040_s22, %s4041_s5  }
 0x144   :  { %s4046_s10 = smov [#allocation18]   ;;  %s4047_s1 = smov [#allocation21]  }
 0x145   :  { %s163_s16 = sshll.u32 %s4046_s10, 4  ;;  %s184_s11 = sshll.u32 %s4047_s1, 4  ;;  %s164_s16 = int_to_ptr.vmem [resolvable:$true] %s163_s16  ;;  %s185_s11 = int_to_ptr.vmem [resolvable:$true] %s184_s11 }
 0x146   :  { %s3875_s20 = scalar_lea.hbm %s4710_s12, 64 }
 0x147   :  { %p3876_p8 = scmp.ne.s32.totalorder %s4710_s12, %s3875_s20  ;;  %p3879_p9 = scmp.lt.u32.totalorder %s3875_s20, %s4710_s12 }
 0x149   :  { %p3881_p10 = pnand %p3879_p9, %p3876_p8 }
 0x14b   :  { %3884 = shalt.err (!%p3881_p10)
}
 0x14c   :  { %s3885_s3 = scalar_lea.vmem %s164_s16, 64  ;;  %p3890_p12 = scmp.lt.s32.totalorder %s164_s16, %s164_s16 }
 0x14d   :  { %p3886_p11 = scmp.ne.s32.totalorder %s164_s16, %s3885_s3  ;;  %p3891_p13 = scmp.lt.s32.totalorder %s3885_s3, %s3885_s3 }
 0x14f   :  { %p3892_p0 = por %p3891_p13, %p3890_p12 }
 0x151   :  { %p3893_p1 = pnand %p3892_p0, %p3886_p11 }
 0x153   :  { %3896 = shalt.err (!%p3893_p1)
}
 0x154   :  { %166 = dma.hbm_to_vmem [thread:$0]  %s4710_s12, 64, %s164_s16, [#allocation17]  }
 0x155   :  { %s3897_s2 = scalar_lea.hbm %s4713_s15, 256 }
 0x156   :  { %p3898_p2 = scmp.ne.s32.totalorder %s4713_s15, %s3897_s2  ;;  %p3901_p3 = scmp.lt.u32.totalorder %s3897_s2, %s4713_s15 }
 0x158   :  { %p3903_p4 = pnand %p3901_p3, %p3898_p2 }
 0x15a   :  { %3906 = shalt.err (!%p3903_p4)
}
 0x15b   :  { %s3907_s14 = scalar_lea.vmem %s185_s11, 256  ;;  %p3912_p6 = scmp.lt.s32.totalorder %s185_s11, %s185_s11 }
 0x15c   :  { %p3908_p5 = scmp.ne.s32.totalorder %s185_s11, %s3907_s14  ;;  %p3913_p7 = scmp.lt.s32.totalorder %s3907_s14, %s3907_s14 }
 0x15e   :  { %p3914_p8 = por %p3913_p7, %p3912_p6 }
 0x160   :  { %p3915_p9 = pnand %p3914_p8, %p3908_p5 }
 0x162   :  { %3918 = shalt.err (!%p3915_p9)
}
 0x163   :  { %190 = dma.hbm_to_vmem [thread:$0]  %s4713_s15, 256, %s185_s11, [#allocation20], %s4040_s22, %s4040_s22, %s4041_s5  }
 0x164   :  { %s4048_s6 = smov [#allocation24]   ;;  %s4049_s28 = smov [#allocation27]  }
 0x165   :  { %s206_s20 = sshll.u32 %s4048_s6, 4  ;;  %s228_s29 = sshll.u32 %s4049_s28, 4  ;;  %s207_s20 = int_to_ptr.vmem [resolvable:$true] %s206_s20  ;;  %s229_s29 = int_to_ptr.vmem [resolvable:$true] %s228_s29 }
 0x166   :  { %s3919_s3 = scalar_lea.hbm %s4715_s17, 4096 }
 0x167   :  { %p3920_p10 = scmp.ne.s32.totalorder %s4715_s17, %s3919_s3  ;;  %p3923_p11 = scmp.lt.u32.totalorder %s3919_s3, %s4715_s17 }
 0x169   :  { %p3925_p12 = pnand %p3923_p11, %p3920_p10 }
 0x16b   :  { %3928 = shalt.err (!%p3925_p12)
}
 0x16c   :  { %s3929_s15 = scalar_lea.vmem %s207_s20, 4096  ;;  %p3934_p0 = scmp.lt.s32.totalorder %s207_s20, %s207_s20 }
 0x16d   :  { %p3930_p13 = scmp.ne.s32.totalorder %s207_s20, %s3929_s15  ;;  %p3935_p1 = scmp.lt.s32.totalorder %s3929_s15, %s3929_s15 }
 0x16f   :  { %p3936_p2 = por %p3935_p1, %p3934_p0 }
 0x171   :  { %p3937_p3 = pnand %p3936_p2, %p3930_p13 }
 0x173   :  { %3940 = shalt.err (!%p3937_p3)
}
 0x174   :  { %212 = dma.hbm_to_vmem [thread:$0]  %s4715_s17, 4096, %s207_s20, [#allocation23], %s4040_s22, %s4040_s22, %s4041_s5  }
 0x175   :  { %s3941_s10 = scalar_lea.hbm %s4717_s19, 4096 }
 0x176   :  { %p3942_p4 = scmp.ne.s32.totalorder %s4717_s19, %s3941_s10  ;;  %p3945_p5 = scmp.lt.u32.totalorder %s3941_s10, %s4717_s19 }
 0x178   :  { %p3947_p6 = pnand %p3945_p5, %p3942_p4 }
 0x17a   :  { %3950 = shalt.err (!%p3947_p6)
}
 0x17b   :  { %s3951_s6 = scalar_lea.vmem %s229_s29, 4096  ;;  %p3956_p8 = scmp.lt.s32.totalorder %s229_s29, %s229_s29 }
 0x17c   :  { %p3952_p7 = scmp.ne.s32.totalorder %s229_s29, %s3951_s6  ;;  %p3957_p9 = scmp.lt.s32.totalorder %s3951_s6, %s3951_s6 }
 0x17e   :  { %p3958_p10 = por %p3957_p9, %p3956_p8 }
 0x180   :  { %p3959_p11 = pnand %p3958_p10, %p3952_p7 }
 0x182   :  { %3962 = shalt.err (!%p3959_p11)
}
 0x183   :  { %234 = dma.hbm_to_vmem [thread:$0]  %s4717_s19, 4096, %s229_s29, [#allocation26], %s4040_s22, %s4040_s22, %s4041_s5  }
 0x184   :  { %s4050_s28 = smov [#allocation30]   ;;  %s4051_s30 = smov [#allocation33]  }
 0x185   :  { %s250_s4 = sshll.u32 %s4050_s28, 4  ;;  %s275_s3 = sshll.u32 %s4051_s30, 4  ;;  %s251_s4 = int_to_ptr.vmem [resolvable:$true] %s250_s4  ;;  %s276_s3 = int_to_ptr.vmem [resolvable:$true] %s275_s3 }
 0x186   :  { %s3963_s27 = scalar_lea.hbm %s4719_s21, 4096 }
 0x187   :  { %p3964_p12 = scmp.ne.s32.totalorder %s4719_s21, %s3963_s27  ;;  %p3967_p13 = scmp.lt.u32.totalorder %s3963_s27, %s4719_s21 }
 0x189   :  { %p3969_p0 = pnand %p3967_p13, %p3964_p12 }
 0x18b   :  { %3972 = shalt.err (!%p3969_p0)
}
 0x18c   :  { %s3973_s19 = scalar_lea.vmem %s251_s4, 4096  ;;  %p3978_p2 = scmp.lt.s32.totalorder %s251_s4, %s251_s4 }
 0x18d   :  { %p3974_p1 = scmp.ne.s32.totalorder %s251_s4, %s3973_s19  ;;  %p3979_p3 = scmp.lt.s32.totalorder %s3973_s19, %s3973_s19 }
 0x18f   :  { %p3980_p4 = por %p3979_p3, %p3978_p2 }
 0x191   :  { %p3981_p5 = pnand %p3980_p4, %p3974_p1 }
 0x193   :  { %3984 = shalt.err (!%p3981_p5)
}
 0x194   :  { %256 = dma.hbm_to_vmem [thread:$0]  %s4719_s21, 4096, %s251_s4, [#allocation29], %s4040_s22, %s4040_s22, %s4041_s5  }
 0x195   :  { %s3985_s1 = scalar_lea.hbm %s4722_s24, 32 }
 0x196   :  { %p3986_p6 = scmp.ne.s32.totalorder %s4722_s24, %s3985_s1  ;;  %p3989_p7 = scmp.lt.u32.totalorder %s3985_s1, %s4722_s24 }
 0x198   :  { %p3991_p8 = pnand %p3989_p7, %p3986_p6 }
 0x19a   :  { %3994 = shalt.err (!%p3991_p8)
}
 0x19b   :  { %s3995_s17 = scalar_lea.vmem %s276_s3, 32  ;;  %p4000_p10 = scmp.lt.s32.totalorder %s276_s3, %s276_s3 }
 0x19c   :  { %p3996_p9 = scmp.ne.s32.totalorder %s276_s3, %s3995_s17  ;;  %p4001_p11 = scmp.lt.s32.totalorder %s3995_s17, %s3995_s17 }
 0x19e   :  { %p4002_p12 = por %p4001_p11, %p4000_p10 }
 0x1a0   :  { %p4003_p13 = pnand %p4002_p12, %p3996_p9 }
 0x1a2   :  { %4006 = shalt.err (!%p4003_p13)
}
 0x1a3   :  { %278 = dma.hbm_to_vmem [thread:$0]  %s4722_s24, 32, %s276_s3, [#allocation32]  }
 0x1a4   :  { %4007 = dma.done.wait [#allocation3], 256  }
 0x1a5   :  { %4008 = vsyncadd [#allocation3], 4294967040 }
 0x1a6   :  { %4009 = dma.done.wait [#allocation5], 4128  }
 0x1a7   :  { %4010 = vsyncadd [#allocation5], 4294963168 }
 0x1a8   :  { %4011 = dma.done.wait [#allocation8], 4128  }
 0x1a9   :  { %4012 = vsyncadd [#allocation8], 4294963168 }
 0x1aa   :  { %4013 = dma.done.wait [#allocation11], 4128  }
 0x1ab   :  { %4014 = vsyncadd [#allocation11], 4294963168 }
 0x1ac   :  { %4015 = dma.done.wait [#allocation14], 4128  }
 0x1ad   :  { %4016 = vsyncadd [#allocation14], 4294963168 }
 0x1ae   :  { %4017 = dma.done.wait [#allocation17], 96  }
 0x1af   :  { %4018 = vsyncadd [#allocation17], 4294967200 }
 0x1b0   :  { %4019 = dma.done.wait [#allocation20], 288  }
 0x1b1   :  { %4020 = vsyncadd [#allocation20], 4294967008 }
 0x1b2   :  { %4021 = dma.done.wait [#allocation23], 4128  }
 0x1b3   :  { %4022 = vsyncadd [#allocation23], 4294963168 }
 0x1b4   :  { %4023 = dma.done.wait [#allocation26], 4128  }
 0x1b5   :  { %4024 = vsyncadd [#allocation26], 4294963168 }
 0x1b6   :  { %4025 = dma.done.wait [#allocation29], 4128  }
 0x1b7   :  { %4026 = vsyncadd [#allocation29], 4294963168 }
 0x1b8   :  { %4027 = dma.done.wait [#allocation32], 64  }
 0x1b9   :  { %4028 = vsyncadd [#allocation32], 4294967232  ;;  %v4052_v0 = vmov 0   ;;  %v3134_v1 = vld [vmem:[#allocation2 + $0x4] ss:$8 sps:$4 sm:$0xff]   ;;  %s4761_s20 = sld [smem:[#allocation45_spill]] }
 0x1ba   :  { %409 = vmatprep.mubr.bf16.mxu1 %v4052_v0  ;;  %v3136_v2 = vld [vmem:[#allocation2] ss:$8 sps:$4 sm:$0xff]   ;;  %377 = vmatprep.subr.bf16.mxu1 %v3134_v1  ;;  %vm373_vm0 = vcmask 130048   ;;  %v3137_v6 = vld [vmem:[#allocation6] ss:$8 sps:$4 sm:$0xff]   ;;  %s4054_s30 = smov 13  }
 0x1bb   :  { %v3139_v5 = vld [vmem:[#allocation6 + $0x4] ss:$8 sps:$4 sm:$0xff]   ;;  %378 = vmatpush1.bf16.msra.mxu1 %v3136_v2  ;;  %v3142_v7 = vld [vmem:[#allocation6 + $0x14] ss:$8 sps:$4 sm:$0xff]   ;;  %v3140_v8 = vld [vmem:[#allocation6 + $0x10] ss:$8 sps:$4 sm:$0xff]   ;;  %v353_v2 = vlaneseq }
 0x1bc   :  { %626 = vmatprep.subr.bf16.mxu1 %v3139_v5  ;;  %v3145_v9 = vld [vmem:[#allocation6 + $0x24] ss:$8 sps:$4 sm:$0xff]   ;;  %v3143_v10 = vld [vmem:[#allocation6 + $0x20] ss:$8 sps:$4 sm:$0xff]   ;;  %v3148_v11 = vld [vmem:[#allocation6 + $0x34] ss:$8 sps:$4 sm:$0xff]  }
 0x1bd   :  { %v3146_v12 = vld [vmem:[#allocation6 + $0x30] ss:$8 sps:$4 sm:$0xff]   ;;  %v3151_v13 = vld [vmem:[#allocation6 + $0x44] ss:$8 sps:$4 sm:$0xff]   ;;  %v3149_v14 = vld [vmem:[#allocation6 + $0x40] ss:$8 sps:$4 sm:$0xff]  }
 0x1be   :  { %v3154_v15 = vld [vmem:[#allocation6 + $0x54] ss:$8 sps:$4 sm:$0xff]   ;;  %v3152_v16 = vld [vmem:[#allocation6 + $0x50] ss:$8 sps:$4 sm:$0xff]   ;;  %v3157_v17 = vld [vmem:[#allocation6 + $0x64] ss:$8 sps:$4 sm:$0xff]  }
 0x1bf   :  { %v347_v3 = vld [vmem:[%s4761_s20] sm:$0xff]  ;;  %v3155_v18 = vld [vmem:[#allocation6 + $0x60] ss:$8 sps:$4 sm:$0xff]   ;;  %s4056_s3 = smov 7   ;;  %s4762_s6 = sld [smem:[#allocation46_spill]]  ;;  %vm2780_vm1 = vcmask 56320  }
 0x1c0   :  { %v4480_v4 = vpack.c.bf16 %v347_v3, %v347_v3  ;;  %v3160_v19 = vld [vmem:[#allocation6 + $0x74] ss:$8 sps:$4 sm:$0xff]   ;;  %v3158_v20 = vld [vmem:[#allocation6 + $0x70] ss:$8 sps:$4 sm:$0xff]   ;;  %v3163_v21 = vld [vmem:[#allocation6 + $0x84] ss:$8 sps:$4 sm:$0xff]  }
 0x1c1   :  { %v3161_v22 = vld [vmem:[#allocation6 + $0x80] ss:$8 sps:$4 sm:$0xff]   ;;  %v3166_v23 = vld [vmem:[#allocation6 + $0x94] ss:$8 sps:$4 sm:$0xff]   ;;  %v3164_v24 = vld [vmem:[#allocation6 + $0x90] ss:$8 sps:$4 sm:$0xff]  }
 0x1c2   :  { %2803 = vmatmul.mubr.msk.bf16.vlgmr.msra.gmra.mrb[0].mxu1 %vm373_vm0, %v4480_v4  ;;  %v3169_v25 = vld [vmem:[#allocation6 + $0xa4] ss:$8 sps:$4 sm:$0xff]   ;;  %v3167_v26 = vld [vmem:[#allocation6 + $0xa0] ss:$8 sps:$4 sm:$0xff]   ;;  %v3172_v27 = vld [vmem:[#allocation6 + $0xb4] ss:$8 sps:$4 sm:$0xff]  }
 0x1c3   :  { %627 = vmatpush1.bf16.msra.mxu1 %v3137_v6  ;;  %v3170_v28 = vld [vmem:[#allocation6 + $0xb0] ss:$8 sps:$4 sm:$0xff]   ;;  %v3175_v29 = vld [vmem:[#allocation6 + $0xc4] ss:$8 sps:$4 sm:$0xff]   ;;  %v3173_v30 = vld [vmem:[#allocation6 + $0xc0] ss:$8 sps:$4 sm:$0xff]  }
 0x1c4   :  { %628 = vmatprep.subr.bf16.mxu1 %v3142_v7  ;;  %v3178_v31 = vld [vmem:[#allocation6 + $0xd4] ss:$8 sps:$4 sm:$0xff]   ;;  %v3176_v32 = vld [vmem:[#allocation6 + $0xd0] ss:$8 sps:$4 sm:$0xff]   ;;  %v3181_v33 = vld [vmem:[#allocation6 + $0xe4] ss:$8 sps:$4 sm:$0xff]  }
 0x1c5   :  { %v3179_v34 = vld [vmem:[#allocation6 + $0xe0] ss:$8 sps:$4 sm:$0xff]   ;;  %v3184_v35 = vld [vmem:[#allocation6 + $0xf4] ss:$8 sps:$4 sm:$0xff]   ;;  %v3182_v36 = vld [vmem:[#allocation6 + $0xf0] ss:$8 sps:$4 sm:$0xff]  }
 0x1c6   :  { %v3185_v37 = vld [vmem:[#allocation9 + $0x4] ss:$8 sps:$4 sm:$0xff]   ;;  %v3187_v38 = vld [vmem:[#allocation9] ss:$8 sps:$4 sm:$0xff]   ;;  %v3188_v39 = vld [vmem:[#allocation9 + $0x14] ss:$8 sps:$4 sm:$0xff]  }
 0x1c7   :  { %629 = vmatpush1.bf16.msra.mxu1 %v3140_v8  ;;  %875 = vmatprep.subr.bf16.mxu0 %v3185_v37  ;;  %v3190_v40 = vld [vmem:[#allocation9 + $0x10] ss:$8 sps:$4 sm:$0xff]   ;;  %v3191_v41 = vld [vmem:[#allocation9 + $0x24] ss:$8 sps:$4 sm:$0xff]   ;;  %v3193_v42 = vld [vmem:[#allocation9 + $0x20] ss:$8 sps:$4 sm:$0xff]  }
 0x1c8   :  { %630 = vmatprep.subr.bf16.mxu1 %v3145_v9  ;;  %876 = vmatpush1.bf16.msra.mxu0 %v3187_v38  ;;  %v3194_v43 = vld [vmem:[#allocation9 + $0x34] ss:$8 sps:$4 sm:$0xff]   ;;  %v3196_v44 = vld [vmem:[#allocation9 + $0x30] ss:$8 sps:$4 sm:$0xff]   ;;  %v3197_v45 = vld [vmem:[#allocation9 + $0x44] ss:$8 sps:$4 sm:$0xff]  }
 0x1c9   :  { %877 = vmatprep.subr.bf16.mxu0 %v3188_v39  ;;  %v3199_v46 = vld [vmem:[#allocation9 + $0x40] ss:$8 sps:$4 sm:$0xff]   ;;  %v3200_v47 = vld [vmem:[#allocation9 + $0x54] ss:$8 sps:$4 sm:$0xff]   ;;  %v3202_v48 = vld [vmem:[#allocation9 + $0x50] ss:$8 sps:$4 sm:$0xff]  }
 0x1ca   :  { %v3203_v49 = vld [vmem:[#allocation9 + $0x64] ss:$8 sps:$4 sm:$0xff]   ;;  %v3205_v50 = vld [vmem:[#allocation9 + $0x60] ss:$8 sps:$4 sm:$0xff]   ;;  %v3206_v51 = vld [vmem:[#allocation9 + $0x74] ss:$8 sps:$4 sm:$0xff]  }
 0x1cb   :  { %631 = vmatpush1.bf16.msra.mxu1 %v3143_v10  ;;  %v3208_v52 = vld [vmem:[#allocation9 + $0x70] ss:$8 sps:$4 sm:$0xff]   ;;  %v3209_v53 = vld [vmem:[#allocation9 + $0x84] ss:$8 sps:$4 sm:$0xff]   ;;  %v3211_v54 = vld [vmem:[#allocation9 + $0x80] ss:$8 sps:$4 sm:$0xff]  }
 0x1cc   :  { %632 = vmatprep.subr.bf16.mxu1 %v3148_v11  ;;  %878 = vmatpush1.bf16.msra.mxu0 %v3190_v40  ;;  %v3212_v55 = vld [vmem:[#allocation9 + $0x94] ss:$8 sps:$4 sm:$0xff]   ;;  %v3214_v56 = vld [vmem:[#allocation9 + $0x90] ss:$8 sps:$4 sm:$0xff]   ;;  %v3215_v57 = vld [vmem:[#allocation9 + $0xa4] ss:$8 sps:$4 sm:$0xff]  }
 0x1cd   :  { %879 = vmatprep.subr.bf16.mxu0 %v3191_v41  ;;  %v3217_v58 = vld [vmem:[#allocation9 + $0xa0] ss:$8 sps:$4 sm:$0xff]   ;;  %v3218_v59 = vld [vmem:[#allocation9 + $0xb4] ss:$8 sps:$4 sm:$0xff]   ;;  %v3220_v60 = vld [vmem:[#allocation9 + $0xb0] ss:$8 sps:$4 sm:$0xff]  }
 0x1ce   :  { %v3221_v61 = vld [vmem:[#allocation9 + $0xc4] ss:$8 sps:$4 sm:$0xff]   ;;  %v3223_v62 = vld [vmem:[#allocation9 + $0xc0] ss:$8 sps:$4 sm:$0xff]   ;;  %v3224_v63 = vld [vmem:[#allocation9 + $0xd4] ss:$8 sps:$4 sm:$0xff]  }
 0x1cf   :  { %633 = vmatpush1.bf16.msra.mxu1 %v3146_v12  ;;  %v3226_v1 = vld [vmem:[#allocation9 + $0xd0] ss:$8 sps:$4 sm:$0xff]   ;;  %v4484_v3 = vshrl.u32 %v353_v2, 7  ;;  %v351_v6 = vld [vmem:[#allocation4] sm:$0x3]  ;;  %vm2782_vm2 = vcmask 64512  }
 0x1d0   :  { %634 = vmatprep.subr.bf16.mxu1 %v3151_v13  ;;  %880 = vmatpush1.bf16.msra.mxu0 %v3193_v42  ;;  %v3251_v37 = vld [vmem:[#allocation12 + $0x60] ss:$8 sps:$4 sm:$0xff]   ;;  %v3256_v38 = vld [vmem:[#allocation12 + $0x74] ss:$8 sps:$4 sm:$0xff]   ;;  %v3254_v39 = vld [vmem:[#allocation12 + $0x70] ss:$8 sps:$4 sm:$0xff]  }
 0x1d1   :  { %881 = vmatprep.subr.bf16.mxu0 %v3194_v43  ;;  %v4487_v5 = vsub.s32 0, %v4484_v3  ;;  %v4490_v7 = vsub.s32 1, %v4484_v3  ;;  %v3259_v40 = vld [vmem:[#allocation12 + $0x84] ss:$8 sps:$4 sm:$0xff]   ;;  %v3257_v41 = vld [vmem:[#allocation12 + $0x80] ss:$8 sps:$4 sm:$0xff]  }
 0x1d2   :  { %v3262_v42 = vld [vmem:[#allocation12 + $0x94] ss:$8 sps:$4 sm:$0xff]   ;;  %v3260_v43 = vld [vmem:[#allocation12 + $0x90] ss:$8 sps:$4 sm:$0xff]   ;;  %v3277_v2 = vld [vmem:[#allocation12 + $0xe4] ss:$8 sps:$4 sm:$0xff]  }
 0x1d3   :  { %635 = vmatpush1.bf16.msra.mxu1 %v3149_v14  ;;  %v356_v8 = vrot.slane %v351_v6, %v4487_v5  ;;  %v360_v9 = vrot.slane %v351_v6, %v4490_v7  ;;  %v3275_v6 = vld [vmem:[#allocation12 + $0xe0] ss:$8 sps:$4 sm:$0xff]   ;;  %vm2784_vm3 = vcmask 72704   ;;  %s4763_s22 = sld [smem:[#allocation57_spill]] }
 0x1d4   :  { %636 = vmatprep.subr.bf16.mxu1 %v3154_v15  ;;  %882 = vmatpush1.bf16.msra.mxu0 %v3196_v44  ;;  %v3265_v44 = vld [vmem:[#allocation12 + $0xa4] ss:$8 sps:$4 sm:$0xff]  }
 0x1d5   :  { %883 = vmatprep.subr.bf16.mxu0 %v3197_v45  ;;  %v3263_v45 = vld [vmem:[#allocation12 + $0xa0] ss:$8 sps:$4 sm:$0xff]  }
 0x1d7   :  { %637 = vmatpush1.bf16.msra.mxu1 %v3152_v16 }
 0x1d8   :  { %638 = vmatprep.subr.bf16.mxu1 %v3157_v17  ;;  %884 = vmatpush1.bf16.msra.mxu0 %v3199_v46  ;;  %v3268_v46 = vld [vmem:[#allocation12 + $0xb4] ss:$8 sps:$4 sm:$0xff]  }
 0x1d9   :  { %885 = vmatprep.subr.bf16.mxu0 %v3200_v47  ;;  %v3266_v47 = vld [vmem:[#allocation12 + $0xb0] ss:$8 sps:$4 sm:$0xff]  }
 0x1db   :  { %639 = vmatpush1.bf16.msra.mxu1 %v3155_v18 }
 0x1dc   :  { %640 = vmatprep.subr.bf16.mxu1 %v3160_v19  ;;  %886 = vmatpush1.bf16.msra.mxu0 %v3202_v48  ;;  %v3271_v48 = vld [vmem:[#allocation12 + $0xc4] ss:$8 sps:$4 sm:$0xff]  }
 0x1dd   :  { %887 = vmatprep.subr.bf16.mxu0 %v3203_v49  ;;  %v3269_v49 = vld [vmem:[#allocation12 + $0xc0] ss:$8 sps:$4 sm:$0xff]  }
 0x1df   :  { %641 = vmatpush1.bf16.msra.mxu1 %v3158_v20  ;;  %v3227_v20 = vld [vmem:[#allocation9 + $0xe4] ss:$8 sps:$4 sm:$0xff]  }
 0x1e0   :  { %642 = vmatprep.subr.bf16.mxu1 %v3163_v21  ;;  %888 = vmatpush1.bf16.msra.mxu0 %v3205_v50  ;;  %v3229_v21 = vld [vmem:[#allocation9 + $0xe0] ss:$8 sps:$4 sm:$0xff]  }
 0x1e1   :  { %889 = vmatprep.subr.bf16.mxu0 %v3206_v51  ;;  %v3274_v50 = vld [vmem:[#allocation12 + $0xd4] ss:$8 sps:$4 sm:$0xff]   ;;  %v3272_v51 = vld [vmem:[#allocation12 + $0xd0] ss:$8 sps:$4 sm:$0xff]  }
 0x1e3   :  { %643 = vmatpush1.bf16.msra.mxu1 %v3161_v22  ;;  %v3230_v22 = vld [vmem:[#allocation9 + $0xf4] ss:$8 sps:$4 sm:$0xff]  }
 0x1e4   :  { %644 = vmatprep.subr.bf16.mxu1 %v3166_v23  ;;  %890 = vmatpush1.bf16.msra.mxu0 %v3208_v52  ;;  %v3232_v23 = vld [vmem:[#allocation9 + $0xf0] ss:$8 sps:$4 sm:$0xff]   ;;  %v454_v52 = vld [vmem:[#allocation7] sm:$0x3] }
 0x1e5   :  { %891 = vmatprep.subr.bf16.mxu0 %v3209_v53  ;;  %v459_v53 = vrot.slane %v454_v52, %v4487_v5 }
 0x1e7   :  { %645 = vmatpush1.bf16.msra.mxu1 %v3164_v24  ;;  %v3233_v24 = vld [vmem:[#allocation12] ss:$8 sps:$4 sm:$0xff]  }
 0x1e8   :  { %646 = vmatprep.subr.bf16.mxu1 %v3169_v25  ;;  %892 = vmatpush1.bf16.msra.mxu0 %v3211_v54  ;;  %v3235_v25 = vld [vmem:[#allocation12 + $0x4] ss:$8 sps:$4 sm:$0xff]   ;;  %v463_v54 = vrot.slane %v454_v52, %v4490_v7 }
 0x1e9   :  { %893 = vmatprep.subr.bf16.mxu0 %v3212_v55  ;;  %v3323_v52 = vld [vmem:[#allocation15 + $0xe0] ss:$8 sps:$4 sm:$0xff]  }
 0x1eb   :  { %647 = vmatpush1.bf16.msra.mxu1 %v3167_v26  ;;  %v3238_v26 = vld [vmem:[#allocation12 + $0x14] ss:$8 sps:$4 sm:$0xff]  }
 0x1ec   :  { %648 = vmatprep.subr.bf16.mxu1 %v3172_v27  ;;  %894 = vmatpush1.bf16.msra.mxu0 %v3214_v56  ;;  %v3236_v27 = vld [vmem:[#allocation12 + $0x10] ss:$8 sps:$4 sm:$0xff]  }
 0x1ed   :  { %895 = vmatprep.subr.bf16.mxu0 %v3215_v57 }
 0x1ef   :  { %649 = vmatpush1.bf16.msra.mxu1 %v3170_v28  ;;  %v3241_v28 = vld [vmem:[#allocation12 + $0x24] ss:$8 sps:$4 sm:$0xff]  }
 0x1f0   :  { %650 = vmatprep.subr.bf16.mxu1 %v3175_v29  ;;  %896 = vmatpush1.bf16.msra.mxu0 %v3217_v58  ;;  %v3239_v29 = vld [vmem:[#allocation12 + $0x20] ss:$8 sps:$4 sm:$0xff]  }
 0x1f1   :  { %897 = vmatprep.subr.bf16.mxu0 %v3218_v59 }
 0x1f3   :  { %651 = vmatpush1.bf16.msra.mxu1 %v3173_v30  ;;  %v3244_v30 = vld [vmem:[#allocation12 + $0x34] ss:$8 sps:$4 sm:$0xff]  }
 0x1f4   :  { %652 = vmatprep.subr.bf16.mxu1 %v3178_v31  ;;  %898 = vmatpush1.bf16.msra.mxu0 %v3220_v60  ;;  %v3242_v31 = vld [vmem:[#allocation12 + $0x30] ss:$8 sps:$4 sm:$0xff]  }
 0x1f5   :  { %899 = vmatprep.subr.bf16.mxu0 %v3221_v61 }
 0x1f7   :  { %653 = vmatpush1.bf16.msra.mxu1 %v3176_v32  ;;  %v3247_v32 = vld [vmem:[#allocation12 + $0x44] ss:$8 sps:$4 sm:$0xff]  }
 0x1f8   :  { %654 = vmatprep.subr.bf16.mxu1 %v3181_v33  ;;  %900 = vmatpush1.bf16.msra.mxu0 %v3223_v62  ;;  %v3245_v33 = vld [vmem:[#allocation12 + $0x40] ss:$8 sps:$4 sm:$0xff]  }
 0x1f9   :  { %901 = vmatprep.subr.bf16.mxu0 %v3224_v63 }
 0x1fb   :  { %655 = vmatpush1.bf16.msra.mxu1 %v3179_v34  ;;  %v3250_v34 = vld [vmem:[#allocation12 + $0x54] ss:$8 sps:$4 sm:$0xff]  }
 0x1fc   :  { %656 = vmatprep.subr.bf16.mxu1 %v3184_v35  ;;  %902 = vmatpush1.bf16.msra.mxu0 %v3226_v1  ;;  %v3248_v35 = vld [vmem:[#allocation12 + $0x50] ss:$8 sps:$4 sm:$0xff]  }
 0x1fd   :  { %903 = vmatprep.subr.bf16.mxu0 %v3227_v20  ;;  %v3298_v20 = vld [vmem:[#allocation15 + $0x54] ss:$8 sps:$4 sm:$0xff]  }
 0x1ff   :  { %657 = vmatpush1.bf16.msra.mxu1 %v3182_v36  ;;  %v3253_v36 = vld [vmem:[#allocation12 + $0x64] ss:$8 sps:$4 sm:$0xff]  }
 0x200   :  { %904 = vmatpush1.bf16.msra.mxu0 %v3229_v21  ;;  %1124 = vmatprep.subr.bf16.mxu1 %v3235_v25  ;;  %v3296_v21 = vld [vmem:[#allocation15 + $0x50] ss:$8 sps:$4 sm:$0xff]  }
 0x201   :  { %905 = vmatprep.subr.bf16.mxu0 %v3230_v22  ;;  %v3301_v22 = vld [vmem:[#allocation15 + $0x64] ss:$8 sps:$4 sm:$0xff]   ;;  %v3302_v25 = vld [vmem:[#allocation15 + $0x70] ss:$8 sps:$4 sm:$0xff]  }
 0x204   :  { %906 = vmatpush1.bf16.msra.mxu0 %v3232_v23  ;;  %v3299_v23 = vld [vmem:[#allocation15 + $0x60] ss:$8 sps:$4 sm:$0xff]  }
 0x295   :  { %v411_v10 = vpop.f32.mrb[0].mxu1 }
 0x296   :  { %v412_v11 = vadd.f32 %v411_v10, %v356_v8  ;;  %v413_v12 = vpop.f32.mrb[1].mxu1  ;;  %v3280_v8 = vld [vmem:[#allocation12 + $0xf4] ss:$8 sps:$4 sm:$0xff]   ;;  %v3281_v10 = vld [vmem:[#allocation15] ss:$8 sps:$4 sm:$0xff]  }
 0x297   :  { %v414_v13 = vadd.f32 %v413_v12, %v360_v9  ;;  %v415_v14 = vpop.f32.mrb[2].mxu1  ;;  %v3278_v9 = vld [vmem:[#allocation12 + $0xf0] ss:$8 sps:$4 sm:$0xff]  }
 0x298   :  { %v418_v15 = vmax.f32 %v412_v11, 0.0  ;;  %v416_v16 = vpop.f32.mrb[3].mxu1  ;;  %v3283_v11 = vld [vmem:[#allocation15 + $0x4] ss:$8 sps:$4 sm:$0xff]   ;;  %v3286_v12 = vld [vmem:[#allocation15 + $0x14] ss:$8 sps:$4 sm:$0xff]  }
 0x299   :  { %v419_v17 = vmax.f32 %v414_v13, 0.0  ;;  %1373 = vmatprep.subr.bf16.mxu0 %v3283_v11  ;;  %v3284_v13 = vld [vmem:[#allocation15 + $0x10] ss:$8 sps:$4 sm:$0xff]   ;;  %v3289_v14 = vld [vmem:[#allocation15 + $0x24] ss:$8 sps:$4 sm:$0xff]   ;;  %v1455_v11 = vsub.s32 3, %v4484_v3 }
 0x29a   :  { %v420_v19 = vpack.c.bf16 %v418_v15, %v418_v15  ;;  %v3287_v15 = vld [vmem:[#allocation15 + $0x20] ss:$8 sps:$4 sm:$0xff]   ;;  %v3292_v16 = vld [vmem:[#allocation15 + $0x34] ss:$8 sps:$4 sm:$0xff]  }
 0x29b   :  { %v421_v18 = vpack.c.bf16 %v419_v17, %v419_v17  ;;  %v3290_v17 = vld [vmem:[#allocation15 + $0x30] ss:$8 sps:$4 sm:$0xff]  }
 0x29d   :  { %658 = vmatprep.mubr.bf16.mxu1 %v421_v18  ;;  %v3295_v18 = vld [vmem:[#allocation15 + $0x44] ss:$8 sps:$4 sm:$0xff]  }
 0x29e   :  { %659 = vmatmul.mubr.bf16.vlgmr.msra.gmra.mrb[4].mxu1 %v420_v19  ;;  %v3293_v19 = vld [vmem:[#allocation15 + $0x40] ss:$8 sps:$4 sm:$0xff]  }
 0x29f   :  { %1125 = vmatpush1.bf16.msra.mxu1 %v3233_v24  ;;  %v3304_v24 = vld [vmem:[#allocation15 + $0x74] ss:$8 sps:$4 sm:$0xff]  }
 0x2a0   :  { %1126 = vmatprep.subr.bf16.mxu1 %v3238_v26  ;;  %v3307_v26 = vld [vmem:[#allocation15 + $0x84] ss:$8 sps:$4 sm:$0xff]  }
 0x2a3   :  { %1127 = vmatpush1.bf16.msra.mxu1 %v3236_v27  ;;  %v3305_v27 = vld [vmem:[#allocation15 + $0x80] ss:$8 sps:$4 sm:$0xff]  }
 0x2a4   :  { %1128 = vmatprep.subr.bf16.mxu1 %v3241_v28  ;;  %v3310_v28 = vld [vmem:[#allocation15 + $0x94] ss:$8 sps:$4 sm:$0xff]  }
 0x2a7   :  { %1129 = vmatpush1.bf16.msra.mxu1 %v3239_v29  ;;  %v3308_v29 = vld [vmem:[#allocation15 + $0x90] ss:$8 sps:$4 sm:$0xff]  }
 0x2a8   :  { %1130 = vmatprep.subr.bf16.mxu1 %v3244_v30  ;;  %v3313_v30 = vld [vmem:[#allocation15 + $0xa4] ss:$8 sps:$4 sm:$0xff]  }
 0x2ab   :  { %1131 = vmatpush1.bf16.msra.mxu1 %v3242_v31  ;;  %v3311_v31 = vld [vmem:[#allocation15 + $0xa0] ss:$8 sps:$4 sm:$0xff]  }
 0x2ac   :  { %1132 = vmatprep.subr.bf16.mxu1 %v3247_v32  ;;  %v3316_v32 = vld [vmem:[#allocation15 + $0xb4] ss:$8 sps:$4 sm:$0xff]  }
 0x2af   :  { %1133 = vmatpush1.bf16.msra.mxu1 %v3245_v33  ;;  %v3314_v33 = vld [vmem:[#allocation15 + $0xb0] ss:$8 sps:$4 sm:$0xff]  }
 0x2b0   :  { %1134 = vmatprep.subr.bf16.mxu1 %v3250_v34  ;;  %v3319_v34 = vld [vmem:[#allocation15 + $0xc4] ss:$8 sps:$4 sm:$0xff]  }
 0x2b3   :  { %1135 = vmatpush1.bf16.msra.mxu1 %v3248_v35  ;;  %v3317_v35 = vld [vmem:[#allocation15 + $0xc0] ss:$8 sps:$4 sm:$0xff]  }
 0x2b4   :  { %1136 = vmatprep.subr.bf16.mxu1 %v3253_v36  ;;  %v3322_v36 = vld [vmem:[#allocation15 + $0xd4] ss:$8 sps:$4 sm:$0xff]  }
 0x2b7   :  { %1137 = vmatpush1.bf16.msra.mxu1 %v3251_v37  ;;  %v3320_v37 = vld [vmem:[#allocation15 + $0xd0] ss:$8 sps:$4 sm:$0xff]  }
 0x2b8   :  { %1138 = vmatprep.subr.bf16.mxu1 %v3256_v38  ;;  %v703_v38 = vld [vmem:[#allocation10] sm:$0x3] }
 0x2bb   :  { %1139 = vmatpush1.bf16.msra.mxu1 %v3254_v39  ;;  %v708_v39 = vrot.slane %v703_v38, %v4487_v5 }
 0x2bc   :  { %1140 = vmatprep.subr.bf16.mxu1 %v3259_v40  ;;  %v712_v40 = vrot.slane %v703_v38, %v4490_v7  ;;  %v2932_v38 = vld [vmem:[%s4711_s13] ss:$0 sm:$0xff]  ;;  %s4055_s13 = smov 14  }
 0x2bf   :  { %1141 = vmatpush1.bf16.msra.mxu1 %v3257_v41 }
 0x2c0   :  { %1142 = vmatprep.subr.bf16.mxu1 %v3262_v42 }
 0x2c3   :  { %1143 = vmatpush1.bf16.msra.mxu1 %v3260_v43 }
 0x2c4   :  { %1144 = vmatprep.subr.bf16.mxu1 %v3265_v44 }
 0x2c7   :  { %1145 = vmatpush1.bf16.msra.mxu1 %v3263_v45 }
 0x2c8   :  { %1146 = vmatprep.subr.bf16.mxu1 %v3268_v46 }
 0x2cb   :  { %1147 = vmatpush1.bf16.msra.mxu1 %v3266_v47 }
 0x2cc   :  { %1148 = vmatprep.subr.bf16.mxu1 %v3271_v48 }
 0x2cf   :  { %1149 = vmatpush1.bf16.msra.mxu1 %v3269_v49 }
 0x2d0   :  { %1150 = vmatprep.subr.bf16.mxu1 %v3274_v50 }
 0x2d3   :  { %1151 = vmatpush1.bf16.msra.mxu1 %v3272_v51  ;;  %v3325_v51 = vld [vmem:[#allocation15 + $0xe4] ss:$8 sps:$4 sm:$0xff]  }
 0x2d4   :  { %1152 = vmatprep.subr.bf16.mxu1 %v3277_v2 }
 0x2d7   :  { %1153 = vmatpush1.bf16.msra.mxu1 %v3275_v6 }
 0x2d8   :  { %1154 = vmatprep.subr.bf16.mxu1 %v3280_v8  ;;  %v1201_v8 = vld [vmem:[#allocation16] sm:$0x3] }
 0x2db   :  { %1155 = vmatpush1.bf16.msra.mxu1 %v3278_v9  ;;  %v1416_v9 = vld [vmem:[#allocation18] sm:$0xf] }
 0x371   :  { %v660_v55 = vpop.f32.mrb[4].mxu1 }
 0x372   :  { %v661_v56 = vadd.f32 %v660_v55, %v459_v53  ;;  %v662_v57 = vpop.f32.mrb[5].mxu1  ;;  %v3328_v53 = vld [vmem:[#allocation15 + $0xf4] ss:$8 sps:$4 sm:$0xff]  }
 0x373   :  { %v663_v58 = vadd.f32 %v662_v57, %v463_v54  ;;  %v664_v59 = vpop.f32.mrb[6].mxu1  ;;  %v3326_v54 = vld [vmem:[#allocation15 + $0xf0] ss:$8 sps:$4 sm:$0xff]   ;;  %v952_v55 = vld [vmem:[#allocation13] sm:$0x3] }
 0x374   :  { %v667_v60 = vmax.f32 %v661_v56, 0.0  ;;  %v665_v61 = vpop.f32.mrb[7].mxu1  ;;  %v957_v56 = vrot.slane %v952_v55, %v4487_v5  ;;  %v961_v57 = vrot.slane %v952_v55, %v4490_v7  ;;  %v3344_v55 = vld [vmem:[#allocation24 + $0x40] ss:$8 sps:$4 sm:$0xff]  }
 0x375   :  { %v668_v62 = vmax.f32 %v663_v58, 0.0 }
 0x376   :  { %v669_v1 = vpack.c.bf16 %v667_v60, %v667_v60 }
 0x377   :  { %v670_v63 = vpack.c.bf16 %v668_v62, %v668_v62 }
 0x379   :  { %907 = vmatprep.mubr.bf16.mxu0 %v670_v63 }
 0x37a   :  { %908 = vmatmul.mubr.bf16.vlgmr.msra.gmra.mrb[0].mxu0 %v669_v1 }
 0x37b   :  { %1374 = vmatpush1.bf16.msra.mxu0 %v3281_v10  ;;  %v1425_v10 = vsub.s32 2, %v4484_v3 }
 0x37c   :  { %1375 = vmatprep.subr.bf16.mxu0 %v3286_v12  ;;  %v1206_v12 = vrot.slane %v1201_v8, %v4487_v5 }
 0x37f   :  { %1376 = vmatpush1.bf16.msra.mxu0 %v3284_v13  ;;  %v1422_v13 = vrot.slane %v1416_v9, %v4487_v5 }
 0x380   :  { %1377 = vmatprep.subr.bf16.mxu0 %v3289_v14  ;;  %v1452_v14 = vrot.slane %v1416_v9, %v4490_v7 }
 0x383   :  { %1378 = vmatpush1.bf16.msra.mxu0 %v3287_v15  ;;  %v1210_v15 = vrot.slane %v1201_v8, %v4490_v7  ;;  %v3367_v8 = vld [vmem:[#allocation24 + $0xb4] ss:$8 sps:$4 sm:$0xff]  }
 0x384   :  { %1379 = vmatprep.subr.bf16.mxu0 %v3292_v16  ;;  %v1426_v16 = vrot.slane %v1416_v9, %v1425_v10 }
 0x387   :  { %1380 = vmatpush1.bf16.msra.mxu0 %v3290_v17  ;;  %v1456_v17 = vrot.slane %v1416_v9, %v1455_v11  ;;  %v3365_v9 = vld [vmem:[#allocation24 + $0xb0] ss:$8 sps:$4 sm:$0xff]   ;;  %v3370_v11 = vld [vmem:[#allocation24 + $0xc4] ss:$8 sps:$4 sm:$0xff]  }
 0x388   :  { %1381 = vmatprep.subr.bf16.mxu0 %v3295_v18 }
 0x38b   :  { %1382 = vmatpush1.bf16.msra.mxu0 %v3293_v19 }
 0x38c   :  { %1383 = vmatprep.subr.bf16.mxu0 %v3298_v20  ;;  %v1432_v20 = vrot.slane %v1422_v13, %v4487_v5  ;;  %v3373_v13 = vld [vmem:[#allocation24 + $0xd4] ss:$8 sps:$4 sm:$0xff]  }
 0x38f   :  { %1384 = vmatpush1.bf16.msra.mxu0 %v3296_v21 }
 0x390   :  { %1385 = vmatprep.subr.bf16.mxu0 %v3301_v22  ;;  %v1462_v22 = vrot.slane %v1452_v14, %v4490_v7  ;;  %v3371_v14 = vld [vmem:[#allocation24 + $0xd0] ss:$8 sps:$4 sm:$0xff]  }
 0x393   :  { %1386 = vmatpush1.bf16.msra.mxu0 %v3299_v23 }
 0x394   :  { %1387 = vmatprep.subr.bf16.mxu0 %v3304_v24  ;;  %v1436_v24 = vrot.slane %v1426_v16, %v4487_v5 }
 0x397   :  { %1388 = vmatpush1.bf16.msra.mxu0 %v3302_v25 }
 0x398   :  { %1389 = vmatprep.subr.bf16.mxu0 %v3307_v26  ;;  %v1466_v26 = vrot.slane %v1456_v17, %v4490_v7 }
 0x39b   :  { %1390 = vmatpush1.bf16.msra.mxu0 %v3305_v27 }
 0x39c   :  { %1391 = vmatprep.subr.bf16.mxu0 %v3310_v28 }
 0x39f   :  { %1392 = vmatpush1.bf16.msra.mxu0 %v3308_v29 }
 0x3a0   :  { %1393 = vmatprep.subr.bf16.mxu0 %v3313_v30 }
 0x3a3   :  { %1394 = vmatpush1.bf16.msra.mxu0 %v3311_v31 }
 0x3a4   :  { %1395 = vmatprep.subr.bf16.mxu0 %v3316_v32 }
 0x3a7   :  { %1396 = vmatpush1.bf16.msra.mxu0 %v3314_v33 }
 0x3a8   :  { %1397 = vmatprep.subr.bf16.mxu0 %v3319_v34 }
 0x3ab   :  { %1398 = vmatpush1.bf16.msra.mxu0 %v3317_v35 }
 0x3ac   :  { %1399 = vmatprep.subr.bf16.mxu0 %v3322_v36  ;;  %v3329_v36 = vld [vmem:[#allocation21] ss:$8 sps:$4 sm:$0xff]  }
 0x3af   :  { %1400 = vmatpush1.bf16.msra.mxu0 %v3320_v37  ;;  %v3331_v37 = vld [vmem:[#allocation21 + $0x4] ss:$8 sps:$4 sm:$0xff]  }
 0x3b0   :  { %1401 = vmatprep.subr.bf16.mxu0 %v3325_v51  ;;  %1528 = vmatprep.subr.bf16.mxu1 %v3331_v37  ;;  %v3338_v51 = vld [vmem:[#allocation24 + $0x20] ss:$8 sps:$4 sm:$0xff]   ;;  %v3389_v37 = vld [vmem:[#allocation27 + $0x30] ss:$8 sps:$4 sm:$0xff]  }
 0x3b3   :  { %1402 = vmatpush1.bf16.msra.mxu0 %v3323_v52  ;;  %v3343_v52 = vld [vmem:[#allocation24 + $0x34] ss:$8 sps:$4 sm:$0xff]  }
 0x3b4   :  { %1403 = vmatprep.subr.bf16.mxu0 %v3328_v53  ;;  %v3341_v53 = vld [vmem:[#allocation24 + $0x30] ss:$8 sps:$4 sm:$0xff]  }
 0x3b7   :  { %1404 = vmatpush1.bf16.msra.mxu0 %v3326_v54  ;;  %v3346_v54 = vld [vmem:[#allocation24 + $0x44] ss:$8 sps:$4 sm:$0xff]  }
 0x44d   :  { %v909_v41 = vpop.f32.mrb[0].mxu0 }
 0x44e   :  { %v910_v42 = vadd.f32 %v909_v41, %v708_v39  ;;  %v911_v43 = vpop.f32.mrb[1].mxu0 }
 0x44f   :  { %v912_v44 = vadd.f32 %v911_v43, %v712_v40  ;;  %v913_v45 = vpop.f32.mrb[2].mxu0  ;;  %v4053_v43 = vmov 14  }
 0x450   :  { %v916_v46 = vmax.f32 %v910_v42, 0.0  ;;  %v914_v47 = vpop.f32.mrb[3].mxu0  ;;  %3133 = vset.pattern.permute.xlu0 %v4053_v43  ;;  %v3334_v45 = vld [vmem:[#allocation24 + $0x4] ss:$8 sps:$4 sm:$0xff]  }
 0x451   :  { %v917_v48 = vmax.f32 %v912_v44, 0.0  ;;  %v3332_v44 = vld [vmem:[#allocation24] ss:$8 sps:$4 sm:$0xff]   ;;  %1793 = vmatprep.subr.bf16.mxu0 %v3334_v45  ;;  %v3401_v45 = vld [vmem:[#allocation27 + $0x70] ss:$8 sps:$4 sm:$0xff]  }
 0x452   :  { %v918_v50 = vpack.c.bf16 %v916_v46, %v916_v46  ;;  %v3398_v43 = vld [vmem:[#allocation27 + $0x60] ss:$8 sps:$4 sm:$0xff]  }
 0x453   :  { %v919_v49 = vpack.c.bf16 %v917_v48, %v917_v48  ;;  %v3337_v48 = vld [vmem:[#allocation24 + $0x14] ss:$8 sps:$4 sm:$0xff]  }
 0x455   :  { %1156 = vmatprep.mubr.bf16.mxu1 %v919_v49 }
 0x456   :  { %1157 = vmatmul.mubr.bf16.vlgmr.msra.gmra.mrb[8].mxu1 %v918_v50  ;;  %v3340_v50 = vld [vmem:[#allocation24 + $0x24] ss:$8 sps:$4 sm:$0xff]  }
 0x457   :  { %1560 = vmatprep.mubr.bf16.mxu1 %v4052_v0  ;;  %1529 = vmatpush1.bf16.msra.mxu1 %v3329_v36  ;;  %v3391_v36 = vld [vmem:[#allocation27 + $0x34] ss:$8 sps:$4 sm:$0xff]  }
 0x45e   :  { %2935 = vmatmul.mubr.msk.bf16.vlgmr.msra.gmra.mrb[12].mxu1 %vm373_vm0, %v4480_v4  ;;  %v3335_v4 = vld [vmem:[#allocation24 + $0x10] ss:$8 sps:$4 sm:$0xff]  }
 0x529   :  { %v1158_v58 = vpop.f32.mrb[8].mxu1 }
 0x52a   :  { %v1159_v59 = vadd.f32 %v1158_v58, %v957_v56  ;;  %v1160_v60 = vpop.f32.mrb[9].mxu1  ;;  %v3349_v56 = vld [vmem:[#allocation24 + $0x54] ss:$8 sps:$4 sm:$0xff]   ;;  %v3352_v58 = vld [vmem:[#allocation24 + $0x64] ss:$8 sps:$4 sm:$0xff]  }
 0x52b   :  { %v1161_v61 = vadd.f32 %v1160_v60, %v961_v57  ;;  %v1162_v62 = vpop.f32.mrb[10].mxu1  ;;  %v3347_v57 = vld [vmem:[#allocation24 + $0x50] ss:$8 sps:$4 sm:$0xff]   ;;  %v3355_v60 = vld [vmem:[#allocation24 + $0x74] ss:$8 sps:$4 sm:$0xff]  }
 0x52c   :  { %v1165_v63 = vmax.f32 %v1159_v59, 0.0  ;;  %v1163_v0 = vpop.f32.mrb[11].mxu1  ;;  %v3350_v59 = vld [vmem:[#allocation24 + $0x60] ss:$8 sps:$4 sm:$0xff]   ;;  %v3358_v62 = vld [vmem:[#allocation24 + $0x84] ss:$8 sps:$4 sm:$0xff]  }
 0x52d   :  { %v1166_v1 = vmax.f32 %v1161_v61, 0.0  ;;  %v3353_v61 = vld [vmem:[#allocation24 + $0x70] ss:$8 sps:$4 sm:$0xff]   ;;  %v3361_v0 = vld [vmem:[#allocation24 + $0x94] ss:$8 sps:$4 sm:$0xff]  }
 0x52e   :  { %v1167_v6 = vpack.c.bf16 %v1165_v63, %v1165_v63  ;;  %v3356_v63 = vld [vmem:[#allocation24 + $0x80] ss:$8 sps:$4 sm:$0xff]  }
 0x52f   :  { %v1168_v2 = vpack.c.bf16 %v1166_v1, %v1166_v1  ;;  %v3359_v1 = vld [vmem:[#allocation24 + $0x90] ss:$8 sps:$4 sm:$0xff]  }
 0x531   :  { %1405 = vmatprep.mubr.bf16.mxu0 %v1168_v2  ;;  %v3364_v2 = vld [vmem:[#allocation24 + $0xa4] ss:$8 sps:$4 sm:$0xff]  }
 0x532   :  { %1406 = vmatmul.mubr.bf16.vlgmr.msra.gmra.mrb[4].mxu0 %v1167_v6  ;;  %v3362_v6 = vld [vmem:[#allocation24 + $0xa0] ss:$8 sps:$4 sm:$0xff]  }
 0x533   :  { %1794 = vmatpush1.bf16.msra.mxu0 %v3332_v44  ;;  %v3403_v44 = vld [vmem:[#allocation27 + $0x74] ss:$8 sps:$4 sm:$0xff]  }
 0x534   :  { %1795 = vmatprep.subr.bf16.mxu0 %v3337_v48  ;;  %v3409_v48 = vld [vmem:[#allocation27 + $0x94] ss:$8 sps:$4 sm:$0xff]  }
 0x537   :  { %1796 = vmatpush1.bf16.msra.mxu0 %v3335_v4  ;;  %v3407_v4 = vld [vmem:[#allocation27 + $0x90] ss:$8 sps:$4 sm:$0xff]  }
 0x538   :  { %1797 = vmatprep.subr.bf16.mxu0 %v3340_v50  ;;  %v3410_v50 = vld [vmem:[#allocation27 + $0xa0] ss:$8 sps:$4 sm:$0xff]  }
 0x53b   :  { %1798 = vmatpush1.bf16.msra.mxu0 %v3338_v51  ;;  %v3415_v51 = vld [vmem:[#allocation27 + $0xb4] ss:$8 sps:$4 sm:$0xff]  }
 0x53c   :  { %1799 = vmatprep.subr.bf16.mxu0 %v3343_v52  ;;  %v3413_v52 = vld [vmem:[#allocation27 + $0xb0] ss:$8 sps:$4 sm:$0xff]  }
 0x53f   :  { %1800 = vmatpush1.bf16.msra.mxu0 %v3341_v53  ;;  %v3418_v53 = vld [vmem:[#allocation27 + $0xc4] ss:$8 sps:$4 sm:$0xff]  }
 0x540   :  { %1801 = vmatprep.subr.bf16.mxu0 %v3346_v54  ;;  %v3416_v54 = vld [vmem:[#allocation27 + $0xc0] ss:$8 sps:$4 sm:$0xff]  }
 0x543   :  { %1802 = vmatpush1.bf16.msra.mxu0 %v3344_v55  ;;  %v3421_v55 = vld [vmem:[#allocation27 + $0xd4] ss:$8 sps:$4 sm:$0xff]  }
 0x544   :  { %1803 = vmatprep.subr.bf16.mxu0 %v3349_v56  ;;  %v3419_v56 = vld [vmem:[#allocation27 + $0xd0] ss:$8 sps:$4 sm:$0xff]  }
 0x547   :  { %1804 = vmatpush1.bf16.msra.mxu0 %v3347_v57  ;;  %v1488_v57 = vld [vmem:[#allocation19] sm:$0x3] }
 0x548   :  { %1805 = vmatprep.subr.bf16.mxu0 %v3352_v58  ;;  %v1489_v58 = vunpack.c.l.bf16 %v1488_v57 }
 0x54b   :  { %1806 = vmatpush1.bf16.msra.mxu0 %v3350_v59  ;;  %v1499_v59 = vrot.slane %v1489_v58, %v4487_v5 }
 0x54c   :  { %1807 = vmatprep.subr.bf16.mxu0 %v3355_v60  ;;  %v1503_v60 = vrot.slane %v1489_v58, %v1425_v10 }
 0x54f   :  { %1808 = vmatpush1.bf16.msra.mxu0 %v3353_v61  ;;  %v1509_v61 = vrot.slane %v1499_v59, %v4487_v5 }
 0x550   :  { %1809 = vmatprep.subr.bf16.mxu0 %v3358_v62  ;;  %v1513_v62 = vrot.slane %v1503_v60, %v4487_v5  ;;  %v3472_v60 = vld [vmem:[#allocation30 + $0xe4] ss:$8 sps:$4 sm:$0xff]  }
 0x553   :  { %1810 = vmatpush1.bf16.msra.mxu0 %v3356_v63  ;;  %v1571_v63 = vld [vmem:[#allocation22] sm:$0x3] }
 0x554   :  { %1811 = vmatprep.subr.bf16.mxu0 %v3361_v0 }
 0x557   :  { %1812 = vmatpush1.bf16.msra.mxu0 %v3359_v1  ;;  %v1576_v1 = vrot.slane %v1571_v63, %v4487_v5 }
 0x558   :  { %1813 = vmatprep.subr.bf16.mxu0 %v3364_v2  ;;  %v1580_v2 = vrot.slane %v1571_v63, %v4490_v7  ;;  %v3473_v63 = vld [vmem:[#allocation30 + $0xf0] ss:$8 sps:$4 sm:$0xff]  }
 0x55b   :  { %1814 = vmatpush1.bf16.msra.mxu0 %v3362_v6 }
 0x55c   :  { %1815 = vmatprep.subr.bf16.mxu0 %v3367_v8 }
 0x55f   :  { %1816 = vmatpush1.bf16.msra.mxu0 %v3365_v9 }
 0x560   :  { %1817 = vmatprep.subr.bf16.mxu0 %v3370_v11 }
 0x605   :  { %v1407_v18 = vpop.f32.mrb[4].mxu0 }
 0x606   :  { %v1408_v19 = vadd.f32 %v1407_v18, %v1206_v12  ;;  %v1409_v21 = vpop.f32.mrb[5].mxu0  ;;  %v3368_v12 = vld [vmem:[#allocation24 + $0xc0] ss:$8 sps:$4 sm:$0xff]  }
 0x607   :  { %v1410_v23 = vadd.f32 %v1409_v21, %v1210_v15  ;;  %v1411_v25 = vpop.f32.mrb[6].mxu0  ;;  %1818 = vmatpush1.bf16.msra.mxu0 %v3368_v12  ;;  %v4518_v15 = vpop.f32.mrb[12].mxu1 }
 0x608   :  { %v1414_v27 = vmax.f32 %v1408_v19, 0.0  ;;  %v1412_v28 = vpop.f32.mrb[7].mxu0  ;;  %1819 = vmatprep.subr.bf16.mxu0 %v3373_v13  ;;  %v4520_v16 = vpop.f32.mrb[13].mxu1 }
 0x609   :  { %v1415_v29 = vmax.f32 %v1410_v23, 0.0  ;;  %v1566_v17 = vpop.f32.mrb[14].mxu1  ;;  %v3379_v28 = vld [vmem:[#allocation24 + $0xf4] ss:$8 sps:$4 sm:$0xff]  }
 0x60a   :  { %v1437_v30 = vmul.f32 %v1432_v20, %v1414_v27  ;;  %v1467_v31 = vmul.f32 %v1462_v22, %v1414_v27  ;;  %v1567_v18 = vpop.f32.mrb[15].mxu1  ;;  %v3544_v20 = vld [vmem:[%s4761_s20] sm:$0xff]  ;;  %v3374_v27 = vld [vmem:[#allocation24 + $0xe0] ss:$8 sps:$4 sm:$0xff]  }
 0x60b   :  { %v1438_v32 = vmul.f32 %v1436_v24, %v1415_v29  ;;  %v1468_v33 = vmul.f32 %v1466_v26, %v1415_v29  ;;  %1820 = vmatpush1.bf16.msra.mxu0 %v3371_v14  ;;  %v3376_v26 = vld [vmem:[#allocation24 + $0xe4] ss:$8 sps:$4 sm:$0xff]   ;;  %v3377_v29 = vld [vmem:[#allocation24 + $0xf0] ss:$8 sps:$4 sm:$0xff]  }
 0x60c   :  { %1821 = vmatprep.subr.bf16.mxu0 %v3376_v26  ;;  %v3424_v18 = vld [vmem:[#allocation27 + $0xe4] ss:$8 sps:$4 sm:$0xff]   ;;  %v3439_v26 = vld [vmem:[#allocation30 + $0x34] ss:$8 sps:$4 sm:$0xff]  }
 0x60d   :  { %v1469_v34 = vadd.f32 %v1468_v33, %v1467_v31  ;;  %v1439_v35 = vadd.f32 %v1438_v32, %v1437_v30  ;;  %v3380_v30 = vld [vmem:[#allocation27] ss:$8 sps:$4 sm:$0xff]   ;;  %v3382_v31 = vld [vmem:[#allocation27 + $0x4] ss:$8 sps:$4 sm:$0xff]   ;;  %v3385_v32 = vld [vmem:[#allocation27 + $0x14] ss:$8 sps:$4 sm:$0xff]  }
 0x60e   :  { %2042 = vmatprep.subr.bf16.mxu1 %v3382_v31  ;;  %v3383_v33 = vld [vmem:[#allocation27 + $0x10] ss:$8 sps:$4 sm:$0xff]  }
 0x60f   :  { %1470 = vadd.xlane.f32.xlu0 %v1469_v34  ;;  %1822 = vmatpush1.bf16.msra.mxu0 %v3374_v27  ;;  %v3388_v34 = vld [vmem:[#allocation27 + $0x24] ss:$8 sps:$4 sm:$0xff]   ;;  %v3437_v27 = vld [vmem:[#allocation30 + $0x30] ss:$8 sps:$4 sm:$0xff]  }
 0x610   :  { %1823 = vmatprep.subr.bf16.mxu0 %v3379_v28  ;;  %2043 = vmatpush1.bf16.msra.mxu1 %v3380_v30  ;;  %v3442_v28 = vld [vmem:[#allocation30 + $0x44] ss:$8 sps:$4 sm:$0xff]   ;;  %v3445_v30 = vld [vmem:[#allocation30 + $0x54] ss:$8 sps:$4 sm:$0xff]   ;;  %v3443_v31 = vld [vmem:[#allocation30 + $0x50] ss:$8 sps:$4 sm:$0xff]  }
 0x611   :  { %2044 = vmatprep.subr.bf16.mxu1 %v3385_v32  ;;  %v3448_v32 = vld [vmem:[#allocation30 + $0x64] ss:$8 sps:$4 sm:$0xff]  }
 0x613   :  { %1440 = vadd.xlane.f32.xlu0 %v1439_v35  ;;  %1824 = vmatpush1.bf16.msra.mxu0 %v3377_v29  ;;  %v3386_v35 = vld [vmem:[#allocation27 + $0x20] ss:$8 sps:$4 sm:$0xff]  }
 0x614   :  { %2045 = vmatpush1.bf16.msra.mxu1 %v3383_v33  ;;  %v3440_v29 = vld [vmem:[#allocation30 + $0x40] ss:$8 sps:$4 sm:$0xff]  }
 0x615   :  { %2046 = vmatprep.subr.bf16.mxu1 %v3388_v34  ;;  %v3446_v33 = vld [vmem:[#allocation30 + $0x60] ss:$8 sps:$4 sm:$0xff]   ;;  %v3451_v34 = vld [vmem:[#allocation30 + $0x74] ss:$8 sps:$4 sm:$0xff]  }
 0x618   :  { %2047 = vmatpush1.bf16.msra.mxu1 %v3386_v35  ;;  %v3449_v35 = vld [vmem:[#allocation30 + $0x70] ss:$8 sps:$4 sm:$0xff]  }
 0x619   :  { %2048 = vmatprep.subr.bf16.mxu1 %v3391_v36  ;;  %v3454_v36 = vld [vmem:[#allocation30 + $0x84] ss:$8 sps:$4 sm:$0xff]  }
 0x61c   :  { %2049 = vmatpush1.bf16.msra.mxu1 %v3389_v37  ;;  %v3452_v37 = vld [vmem:[#allocation30 + $0x80] ss:$8 sps:$4 sm:$0xff]  }
 0x69c   :  { %v1471_v39 = vpop.xlane.xlu0 %1470 }
 0x69d   :  { %v1472_v40 = vadd.f32 %v2932_v38, %v1471_v39  ;;  %v3392_v39 = vld [vmem:[#allocation27 + $0x40] ss:$8 sps:$4 sm:$0xff]  }
 0x69f   :  { %v1473_v41 = vmul.f32 0.5, %v1472_v40 }
 0x6a0   :  { %v1441_v47 = vpop.xlane.xlu0 %1440 }
 0x6a1   :  { %v1474_v42 = vmul.f32 1.442695, %v1473_v41  ;;  %v1448_v49 = vadd.f32 %v2932_v38, %v1441_v47  ;;  %v3394_v38 = vld [vmem:[#allocation27 + $0x44] ss:$8 sps:$4 sm:$0xff]   ;;  %v3395_v41 = vld [vmem:[#allocation27 + $0x50] ss:$8 sps:$4 sm:$0xff]  }
 0x6a2   :  { %2050 = vmatprep.subr.bf16.mxu1 %v3394_v38  ;;  %v3404_v47 = vld [vmem:[#allocation27 + $0x80] ss:$8 sps:$4 sm:$0xff]  }
 0x6a3   :  { %3540 = vpow2.f32 %v1474_v42  ;;  %2051 = vmatpush1.bf16.msra.mxu1 %v3392_v39  ;;  %v3400_v42 = vld [vmem:[#allocation27 + $0x64] ss:$8 sps:$4 sm:$0xff]   ;;  %v3457_v38 = vld [vmem:[#allocation30 + $0x94] ss:$8 sps:$4 sm:$0xff]   ;;  %v3455_v39 = vld [vmem:[#allocation30 + $0x90] ss:$8 sps:$4 sm:$0xff]  }
 0x6ad   :  { %v3541_v46 = vpop.eup %3540 }
 0x6ae   :  { %1477 = vrot.lane.b32.xlu1 %v3541_v46, %s4054_s30  ;;  %v3406_v46 = vld [vmem:[#allocation27 + $0x84] ss:$8 sps:$4 sm:$0xff]  }
 0x6b2   :  { %1482 = vrot.lane.b32.xlu1 %v1448_v49, %s4055_s13 }
 0x6b6   :  { %2773 = vrot.lane.b32.xlu1 %v1448_v49, %s4056_s3  ;;  %v3412_v49 = vld [vmem:[#allocation27 + $0xa4] ss:$8 sps:$4 sm:$0xff]  }
 0x6ba   :  { %2777 = vrot.lane.b32.xlu1 %v1472_v40, %s4056_s3  ;;  %v3397_v40 = vld [vmem:[#allocation27 + $0x54] ss:$8 sps:$4 sm:$0xff]  }
 0x6bb   :  { %2052 = vmatprep.subr.bf16.mxu1 %v3397_v40  ;;  %v3460_v40 = vld [vmem:[#allocation30 + $0xa4] ss:$8 sps:$4 sm:$0xff]  }
 0x6bc   :  { %2053 = vmatpush1.bf16.msra.mxu1 %v3395_v41  ;;  %v3458_v41 = vld [vmem:[#allocation30 + $0xa0] ss:$8 sps:$4 sm:$0xff]  }
 0x6bd   :  { %2054 = vmatprep.subr.bf16.mxu1 %v3400_v42  ;;  %v3463_v42 = vld [vmem:[#allocation30 + $0xb4] ss:$8 sps:$4 sm:$0xff]  }
 0x6c0   :  { %2055 = vmatpush1.bf16.msra.mxu1 %v3398_v43  ;;  %v3461_v43 = vld [vmem:[#allocation30 + $0xb0] ss:$8 sps:$4 sm:$0xff]  }
 0x6c1   :  { %2056 = vmatprep.subr.bf16.mxu1 %v3403_v44  ;;  %v3466_v44 = vld [vmem:[#allocation30 + $0xc4] ss:$8 sps:$4 sm:$0xff]  }
 0x6c4   :  { %2057 = vmatpush1.bf16.msra.mxu1 %v3401_v45  ;;  %v3464_v45 = vld [vmem:[#allocation30 + $0xc0] ss:$8 sps:$4 sm:$0xff]  }
 0x6c5   :  { %2058 = vmatprep.subr.bf16.mxu1 %v3406_v46  ;;  %v3469_v46 = vld [vmem:[#allocation30 + $0xd4] ss:$8 sps:$4 sm:$0xff]  }
 0x6c8   :  { %2059 = vmatpush1.bf16.msra.mxu1 %v3404_v47  ;;  %v3467_v47 = vld [vmem:[#allocation30 + $0xd0] ss:$8 sps:$4 sm:$0xff]  }
 0x6c9   :  { %2060 = vmatprep.subr.bf16.mxu1 %v3409_v48  ;;  %v1621_v48 = vld [vmem:[#allocation25] sm:$0x3] }
 0x6cc   :  { %2061 = vmatpush1.bf16.msra.mxu1 %v3407_v4  ;;  %v1626_v4 = vrot.slane %v1621_v48, %v4487_v5 }
 0x6cd   :  { %2062 = vmatprep.subr.bf16.mxu1 %v3412_v49  ;;  %v1630_v49 = vrot.slane %v1621_v48, %v4490_v7  ;;  %v3524_v48 = vld [vmem:[%s4723_s25 + $0x40] sm:$0xff]  }
 0x6d0   :  { %2063 = vmatpush1.bf16.msra.mxu1 %v3410_v50 }
 0x6d1   :  { %2064 = vmatprep.subr.bf16.mxu1 %v3415_v51 }
 0x6d4   :  { %2065 = vmatpush1.bf16.msra.mxu1 %v3413_v52 }
 0x6d5   :  { %2066 = vmatprep.subr.bf16.mxu1 %v3418_v53 }
 0x6d8   :  { %2067 = vmatpush1.bf16.msra.mxu1 %v3416_v54 }
 0x6d9   :  { %2068 = vmatprep.subr.bf16.mxu1 %v3421_v55 }
 0x6dc   :  { %2069 = vmatpush1.bf16.msra.mxu1 %v3419_v56 }
 0x6dd   :  { %2070 = vmatprep.subr.bf16.mxu1 %v3424_v18  ;;  %v3494_v18 = vld [vmem:[%s4721_s23 + $0x60] ss:$8 sps:$4 sm:$0xff]  }
 0x720   :  { %v1478_v19 = vpop.permute.xlu1 %1477 }
 0x721   :  { %v1480_v21 = vmul.f32 %v3544_v20, %v1478_v19  ;;  %v3422_v19 = vld [vmem:[#allocation27 + $0xe0] ss:$8 sps:$4 sm:$0xff]   ;;  %v3427_v20 = vld [vmem:[#allocation27 + $0xf4] ss:$8 sps:$4 sm:$0xff]  }
 0x722   :  { %2071 = vmatpush1.bf16.msra.mxu1 %v3422_v19  ;;  %v3499_v19 = vld [vmem:[%s4721_s23 + $0x74] ss:$8 sps:$4 sm:$0xff]  }
 0x723   :  { %2072 = vmatprep.subr.bf16.mxu1 %v3427_v20  ;;  %v3497_v20 = vld [vmem:[%s4721_s23 + $0x70] ss:$8 sps:$4 sm:$0xff]  }
 0x724   :  { %v1483_v22 = vpop.permute.xlu1 %1482 }
 0x725   :  { %v1485_v23 = vadd.f32 %v1483_v22, %v1480_v21  ;;  %v3425_v21 = vld [vmem:[#allocation27 + $0xf0] ss:$8 sps:$4 sm:$0xff]   ;;  %v3428_v22 = vld [vmem:[#allocation30] ss:$8 sps:$4 sm:$0xff]  }
 0x726   :  { %2073 = vmatpush1.bf16.msra.mxu1 %v3425_v21  ;;  %v3502_v21 = vld [vmem:[%s4721_s23 + $0x84] ss:$8 sps:$4 sm:$0xff]  }
 0x727   :  { %v1486_v24 = vpack.c.bf16 %v1485_v23, %v1485_v23  ;;  %v3433_v23 = vld [vmem:[#allocation30 + $0x14] ss:$8 sps:$4 sm:$0xff]  }
 0x729   :  { %v1487_v25 = vunpack.c.l.bf16 %v1486_v24  ;;  %v3436_v24 = vld [vmem:[#allocation30 + $0x24] ss:$8 sps:$4 sm:$0xff]  }
 0x72b   :  { %1492 = vperm.xlu0 %3133, %v1487_v25   ;;  %v3434_v25 = vld [vmem:[#allocation30 + $0x20] ss:$8 sps:$4 sm:$0xff]  }
 0x7aa   :  { %v1493_v0 = vpop.permute.xlu0 %1492 }
 0x7ab   :  { %v1514_v6 = vmul.f32 %v1509_v61, %v1493_v0  ;;  %v1515_v8 = vmul.f32 %v1513_v62, %v1493_v0  ;;  %v3470_v61 = vld [vmem:[#allocation30 + $0xe0] ss:$8 sps:$4 sm:$0xff]   ;;  %v3475_v62 = vld [vmem:[#allocation30 + $0xf4] ss:$8 sps:$4 sm:$0xff]  }
 0x7ac   :  { %v3476_v0 = vld [vmem:[%s4721_s23] ss:$8 sps:$4 sm:$0xff]  }
 0x7ad   :  { %v1569_v9 = vadd.f32 %v4518_v15, %v1514_v6  ;;  %v1570_v11 = vadd.f32 %v4520_v16, %v1515_v8  ;;  %v3430_v15 = vld [vmem:[#allocation30 + $0x4] ss:$8 sps:$4 sm:$0xff]   ;;  %v3431_v16 = vld [vmem:[#allocation30 + $0x10] ss:$8 sps:$4 sm:$0xff]  }
 0x7ae   :  { %2291 = vmatprep.subr.bf16.mxu0 %v3430_v15  ;;  %v3479_v6 = vld [vmem:[%s4721_s23 + $0x10] ss:$8 sps:$4 sm:$0xff]   ;;  %v3484_v8 = vld [vmem:[%s4721_s23 + $0x24] ss:$8 sps:$4 sm:$0xff]   ;;  %v3505_v15 = vld [vmem:[%s4721_s23 + $0x94] ss:$8 sps:$4 sm:$0xff]  }
 0x7af   :  { %v1583_v12 = vadd.f32 %v1576_v1, %v1569_v9  ;;  %v1584_v13 = vadd.f32 %v1580_v2, %v1570_v11  ;;  %v3478_v1 = vld [vmem:[%s4721_s23 + $0x4] ss:$8 sps:$4 sm:$0xff]   ;;  %v3481_v2 = vld [vmem:[%s4721_s23 + $0x14] ss:$8 sps:$4 sm:$0xff]   ;;  %v3482_v9 = vld [vmem:[%s4721_s23 + $0x20] ss:$8 sps:$4 sm:$0xff]  }
 0x7b0   :  { %2540 = vmatprep.subr.bf16.mxu1 %v3478_v1  ;;  %v3487_v11 = vld [vmem:[%s4721_s23 + $0x34] ss:$8 sps:$4 sm:$0xff]  }
 0x7b1   :  { %v1585_v3 = vmax.f32 %v1583_v12, 0.0  ;;  %v1586_v10 = vmax.f32 %v1584_v13, 0.0  ;;  %v3485_v12 = vld [vmem:[%s4721_s23 + $0x30] ss:$8 sps:$4 sm:$0xff]   ;;  %v3490_v13 = vld [vmem:[%s4721_s23 + $0x44] ss:$8 sps:$4 sm:$0xff]  }
 0x7b3   :  { %v1587_v14 = vpack.c.bf16 %v1585_v3, %v1585_v3  ;;  %v1588_v17 = vpack.c.bf16 %v1586_v10, %v1586_v10  ;;  %v3488_v3 = vld [vmem:[%s4721_s23 + $0x40] ss:$8 sps:$4 sm:$0xff]   ;;  %v3493_v10 = vld [vmem:[%s4721_s23 + $0x54] ss:$8 sps:$4 sm:$0xff]  }
 0x7b5   :  { %1825 = vmatprep.mubr.bf16.mxu0 %v1588_v17  ;;  %v3496_v17 = vld [vmem:[%s4721_s23 + $0x64] ss:$8 sps:$4 sm:$0xff]  }
 0x7b6   :  { %1826 = vmatmul.mubr.bf16.vlgmr.msra.gmra.mrb[8].mxu0 %v1587_v14  ;;  %v3491_v14 = vld [vmem:[%s4721_s23 + $0x50] ss:$8 sps:$4 sm:$0xff]  }
 0x7b7   :  { %2292 = vmatpush1.bf16.msra.mxu0 %v3428_v22  ;;  %v3500_v22 = vld [vmem:[%s4721_s23 + $0x80] ss:$8 sps:$4 sm:$0xff]  }
 0x7b8   :  { %2293 = vmatprep.subr.bf16.mxu0 %v3433_v23  ;;  %v3503_v23 = vld [vmem:[%s4721_s23 + $0x90] ss:$8 sps:$4 sm:$0xff]  }
 0x7bb   :  { %2294 = vmatpush1.bf16.msra.mxu0 %v3431_v16  ;;  %v3508_v16 = vld [vmem:[%s4721_s23 + $0xa4] ss:$8 sps:$4 sm:$0xff]  }
 0x7bc   :  { %2295 = vmatprep.subr.bf16.mxu0 %v3436_v24  ;;  %v3506_v24 = vld [vmem:[%s4721_s23 + $0xa0] ss:$8 sps:$4 sm:$0xff]  }
 0x7bf   :  { %2296 = vmatpush1.bf16.msra.mxu0 %v3434_v25  ;;  %v3511_v25 = vld [vmem:[%s4721_s23 + $0xb4] ss:$8 sps:$4 sm:$0xff]  }
 0x7c0   :  { %2297 = vmatprep.subr.bf16.mxu0 %v3439_v26  ;;  %v3509_v26 = vld [vmem:[%s4721_s23 + $0xb0] ss:$8 sps:$4 sm:$0xff]  }
 0x7c3   :  { %2298 = vmatpush1.bf16.msra.mxu0 %v3437_v27  ;;  %v3514_v27 = vld [vmem:[%s4721_s23 + $0xc4] ss:$8 sps:$4 sm:$0xff]  }
 0x7c4   :  { %2299 = vmatprep.subr.bf16.mxu0 %v3442_v28  ;;  %v3512_v28 = vld [vmem:[%s4721_s23 + $0xc0] ss:$8 sps:$4 sm:$0xff]  }
 0x7c7   :  { %2300 = vmatpush1.bf16.msra.mxu0 %v3440_v29  ;;  %v3517_v29 = vld [vmem:[%s4721_s23 + $0xd4] ss:$8 sps:$4 sm:$0xff]  }
 0x7c8   :  { %2301 = vmatprep.subr.bf16.mxu0 %v3445_v30  ;;  %v3515_v30 = vld [vmem:[%s4721_s23 + $0xd0] ss:$8 sps:$4 sm:$0xff]  }
 0x7cb   :  { %2302 = vmatpush1.bf16.msra.mxu0 %v3443_v31  ;;  %v1870_v31 = vld [vmem:[#allocation28] sm:$0x3] }
 0x7cc   :  { %2303 = vmatprep.subr.bf16.mxu0 %v3448_v32  ;;  %v1875_v32 = vrot.slane %v1870_v31, %v4487_v5 }
 0x7cf   :  { %2304 = vmatpush1.bf16.msra.mxu0 %v3446_v33  ;;  %v1879_v33 = vrot.slane %v1870_v31, %v4490_v7 }
 0x7d0   :  { %2305 = vmatprep.subr.bf16.mxu0 %v3451_v34 }
 0x7d3   :  { %2306 = vmatpush1.bf16.msra.mxu0 %v3449_v35 }
 0x7d4   :  { %2307 = vmatprep.subr.bf16.mxu0 %v3454_v36 }
 0x7d7   :  { %2308 = vmatpush1.bf16.msra.mxu0 %v3452_v37 }
 0x7d8   :  { %2309 = vmatprep.subr.bf16.mxu0 %v3457_v38 }
 0x7db   :  { %2310 = vmatpush1.bf16.msra.mxu0 %v3455_v39 }
 0x7dc   :  { %2311 = vmatprep.subr.bf16.mxu0 %v3460_v40 }
 0x7df   :  { %2312 = vmatpush1.bf16.msra.mxu0 %v3458_v41 }
 0x7e0   :  { %2313 = vmatprep.subr.bf16.mxu0 %v3463_v42 }
 0x7e3   :  { %2314 = vmatpush1.bf16.msra.mxu0 %v3461_v43 }
 0x7e4   :  { %2315 = vmatprep.subr.bf16.mxu0 %v3466_v44  ;;  %v3520_v44 = vld [vmem:[%s4721_s23 + $0xe4] ss:$8 sps:$4 sm:$0xff]  }
 0x7e7   :  { %2316 = vmatpush1.bf16.msra.mxu0 %v3464_v45  ;;  %v3518_v45 = vld [vmem:[%s4721_s23 + $0xe0] ss:$8 sps:$4 sm:$0xff]  }
 0x7e8   :  { %2317 = vmatprep.subr.bf16.mxu0 %v3469_v46  ;;  %v3523_v46 = vld [vmem:[%s4721_s23 + $0xf4] ss:$8 sps:$4 sm:$0xff]  }
 0x7eb   :  { %2318 = vmatpush1.bf16.msra.mxu0 %v3467_v47  ;;  %v3521_v47 = vld [vmem:[%s4721_s23 + $0xf0] ss:$8 sps:$4 sm:$0xff]  }
 0x7ec   :  { %2319 = vmatprep.subr.bf16.mxu0 %v3472_v60 }
 0x7ef   :  { %2320 = vmatpush1.bf16.msra.mxu0 %v3470_v61 }
 0x7f0   :  { %2321 = vmatprep.subr.bf16.mxu0 %v3475_v62 }
 0x7f3   :  { %2322 = vmatpush1.bf16.msra.mxu0 %v3473_v63 }
 0x7f4   :  { %3083 = vmatprep.subr.bf16.mxu0 %v3524_v48 }
 0x889   :  { %v1827_v50 = vpop.f32.mrb[8].mxu0 }
 0x88a   :  { %v1828_v51 = vadd.f32 %v1827_v50, %v1626_v4  ;;  %v1829_v52 = vpop.f32.mrb[9].mxu0  ;;  %v3525_v4 = vld [vmem:[%s4723_s25] sm:$0xff]   ;;  %v3527_v50 = vld [vmem:[%s4723_s25 + $0x8] sm:$0xff]  }
 0x88b   :  { %v1830_v53 = vadd.f32 %v1829_v52, %v1630_v49  ;;  %v1831_v54 = vpop.f32.mrb[10].mxu0  ;;  %v3526_v49 = vld [vmem:[%s4723_s25 + $0x48] sm:$0xff]   ;;  %v3529_v52 = vld [vmem:[%s4723_s25 + $0x10] sm:$0xff]  }
 0x88c   :  { %v1834_v55 = vmax.f32 %v1828_v51, 0.0  ;;  %v1832_v56 = vpop.f32.mrb[11].mxu0  ;;  %v3528_v51 = vld [vmem:[%s4723_s25 + $0x50] sm:$0xff]   ;;  %v3531_v54 = vld [vmem:[%s4723_s25 + $0x18] sm:$0xff]  }
 0x88d   :  { %v1835_v57 = vmax.f32 %v1830_v53, 0.0  ;;  %v3530_v53 = vld [vmem:[%s4723_s25 + $0x58] sm:$0xff]   ;;  %v3533_v56 = vld [vmem:[%s4723_s25 + $0x20] sm:$0xff]  }
 0x88e   :  { %v1836_v59 = vpack.c.bf16 %v1834_v55, %v1834_v55  ;;  %v3532_v55 = vld [vmem:[%s4723_s25 + $0x60] sm:$0xff]  }
 0x88f   :  { %v1837_v58 = vpack.c.bf16 %v1835_v57, %v1835_v57  ;;  %v3534_v57 = vld [vmem:[%s4723_s25 + $0x68] sm:$0xff]  }
 0x891   :  { %2074 = vmatprep.mubr.bf16.mxu1 %v1837_v58  ;;  %v3535_v58 = vld [vmem:[%s4723_s25 + $0x28] sm:$0xff]  }
 0x892   :  { %2075 = vmatmul.mubr.bf16.vlgmr.msra.gmra.mrb[16].mxu1 %v1836_v59  ;;  %v2119_v59 = vld [vmem:[#allocation31] sm:$0x3] }
 0x893   :  { %2541 = vmatpush1.bf16.msra.mxu1 %v3476_v0  ;;  %v2124_v60 = vrot.slane %v2119_v59, %v4487_v5  ;;  %v2128_v61 = vrot.slane %v2119_v59, %v4490_v7 }
 0x894   :  { %2542 = vmatprep.subr.bf16.mxu1 %v3481_v2 }
 0x897   :  { %2543 = vmatpush1.bf16.msra.mxu1 %v3479_v6 }
 0x898   :  { %2544 = vmatprep.subr.bf16.mxu1 %v3484_v8 }
 0x89b   :  { %2545 = vmatpush1.bf16.msra.mxu1 %v3482_v9 }
 0x89c   :  { %2546 = vmatprep.subr.bf16.mxu1 %v3487_v11 }
 0x89f   :  { %2547 = vmatpush1.bf16.msra.mxu1 %v3485_v12 }
 0x8a0   :  { %2548 = vmatprep.subr.bf16.mxu1 %v3490_v13  ;;  %v3536_v13 = vld [vmem:[%s4723_s25 + $0x70] sm:$0xff]  }
 0x8a3   :  { %2549 = vmatpush1.bf16.msra.mxu1 %v3488_v3  ;;  %v3537_v3 = vld [vmem:[%s4723_s25 + $0x30] sm:$0xff]  }
 0x8a4   :  { %2550 = vmatprep.subr.bf16.mxu1 %v3493_v10  ;;  %v3538_v10 = vld [vmem:[%s4723_s25 + $0x78] sm:$0xff]  }
 0x8a7   :  { %2551 = vmatpush1.bf16.msra.mxu1 %v3491_v14  ;;  %v3539_v14 = vld [vmem:[%s4723_s25 + $0x38] sm:$0xff]  }
 0x8a8   :  { %2552 = vmatprep.subr.bf16.mxu1 %v3496_v17  ;;  %v2368_v17 = vld [vmem:[#allocation33] sm:$0x3] }
 0x8ab   :  { %2553 = vmatpush1.bf16.msra.mxu1 %v3494_v18  ;;  %v2373_v18 = vrot.slane %v2368_v17, %v4487_v5 }
 0x8ac   :  { %2554 = vmatprep.subr.bf16.mxu1 %v3499_v19  ;;  %v2377_v19 = vrot.slane %v2368_v17, %v4490_v7 }
 0x8af   :  { %2555 = vmatpush1.bf16.msra.mxu1 %v3497_v20 }
 0x8b0   :  { %2556 = vmatprep.subr.bf16.mxu1 %v3502_v21 }
 0x8b3   :  { %2557 = vmatpush1.bf16.msra.mxu1 %v3500_v22 }
 0x8b4   :  { %2558 = vmatprep.subr.bf16.mxu1 %v3505_v15 }
 0x8b7   :  { %2559 = vmatpush1.bf16.msra.mxu1 %v3503_v23 }
 0x8b8   :  { %2560 = vmatprep.subr.bf16.mxu1 %v3508_v16 }
 0x8bb   :  { %2561 = vmatpush1.bf16.msra.mxu1 %v3506_v24 }
 0x8bc   :  { %2562 = vmatprep.subr.bf16.mxu1 %v3511_v25 }
 0x8bf   :  { %2563 = vmatpush1.bf16.msra.mxu1 %v3509_v26 }
 0x8c0   :  { %2564 = vmatprep.subr.bf16.mxu1 %v3514_v27 }
 0x8c3   :  { %2565 = vmatpush1.bf16.msra.mxu1 %v3512_v28 }
 0x8c4   :  { %2566 = vmatprep.subr.bf16.mxu1 %v3517_v29  ;;  %v3064_v29 = vld [vmem:[%s4724_s26] ss:$0 sm:$0xff] }
 0x8c7   :  { %2567 = vmatpush1.bf16.msra.mxu1 %v3515_v30 }
 0x8c8   :  { %2568 = vmatprep.subr.bf16.mxu1 %v3520_v44 }
 0x8cb   :  { %2569 = vmatpush1.bf16.msra.mxu1 %v3518_v45 }
 0x8cc   :  { %2570 = vmatprep.subr.bf16.mxu1 %v3523_v46 }
 0x8cf   :  { %2571 = vmatpush1.bf16.msra.mxu1 %v3521_v47 }
 0x965   :  { %v2076_v34 = vpop.f32.mrb[16].mxu1 }
 0x966   :  { %v2077_v35 = vadd.f32 %v2076_v34, %v1875_v32  ;;  %v2078_v36 = vpop.f32.mrb[17].mxu1  ;;  %v2774_v34 = vpop.permute.xlu1 %2773 }
 0x967   :  { %v2079_v37 = vadd.f32 %v2078_v36, %v1879_v33  ;;  %v2080_v38 = vpop.f32.mrb[18].mxu1  ;;  %v3081_v33 = vld [vmem:[%s4762_s6] ss:$0 sm:$0xff]  ;;  %v3082_v36 = vld [vmem:[%s4762_s6 + $0x1] ss:$0 sm:$0xff] }
 0x968   :  { %v2083_v39 = vmax.f32 %v2077_v35, 0.0  ;;  %v2081_v40 = vpop.f32.mrb[19].mxu1 }
 0x969   :  { %v2084_v41 = vmax.f32 %v2079_v37, 0.0 }
 0x96a   :  { %v2085_v43 = vpack.c.bf16 %v2083_v39, %v2083_v39  ;;  %v2778_v39 = vpop.permute.xlu1 %2777 }
 0x96b   :  { %v2086_v42 = vpack.c.bf16 %v2084_v41, %v2084_v41 }
 0x96d   :  { %2323 = vmatprep.mubr.bf16.mxu0 %v2086_v42 }
 0x96e   :  { %2324 = vmatmul.mubr.bf16.vlgmr.msra.gmra.mrb[12].mxu0 %v2085_v43 }
 0x96f   :  { %3084 = vmatpush3.bf16.msra.mxu0 %v3525_v4 }
 0x970   :  { %3085 = vmatprep.subr.bf16.mxu0 %v3526_v49 }
 0x973   :  { %3086 = vmatpush3.bf16.msra.mxu0 %v3527_v50 }
 0x974   :  { %3087 = vmatprep.subr.bf16.mxu0 %v3528_v51 }
 0x977   :  { %3088 = vmatpush3.bf16.msra.mxu0 %v3529_v52 }
 0x978   :  { %3089 = vmatprep.subr.bf16.mxu0 %v3530_v53 }
 0x97b   :  { %3090 = vmatpush3.bf16.msra.mxu0 %v3531_v54 }
 0x97c   :  { %3091 = vmatprep.subr.bf16.mxu0 %v3532_v55 }
 0x97f   :  { %3092 = vmatpush3.bf16.msra.mxu0 %v3533_v56 }
 0x980   :  { %3093 = vmatprep.subr.bf16.mxu0 %v3534_v57 }
 0x983   :  { %3094 = vmatpush3.bf16.msra.mxu0 %v3535_v58 }
 0x984   :  { %3095 = vmatprep.subr.bf16.mxu0 %v3536_v13 }
 0x987   :  { %3096 = vmatpush3.bf16.msra.mxu0 %v3537_v3 }
 0x988   :  { %3097 = vmatprep.subr.bf16.mxu0 %v3538_v10 }
 0x98b   :  { %3098 = vmatpush3.bf16.msra.mxu0 %v3539_v14 }
 0xa41   :  { %v2325_v62 = vpop.f32.mrb[12].mxu0 }
 0xa42   :  { %v2326_v63 = vadd.f32 %v2325_v62, %v2124_v60  ;;  %v2327_v0 = vpop.f32.mrb[13].mxu0 }
 0xa43   :  { %v2328_v1 = vadd.f32 %v2327_v0, %v2128_v61  ;;  %v2329_v2 = vpop.f32.mrb[14].mxu0 }
 0xa44   :  { %v2332_v6 = vmax.f32 %v2326_v63, 0.0  ;;  %v2330_v8 = vpop.f32.mrb[15].mxu0 }
 0xa45   :  { %v2333_v9 = vmax.f32 %v2328_v1, 0.0 }
 0xa46   :  { %v2334_v12 = vpack.c.bf16 %v2332_v6, %v2332_v6 }
 0xa47   :  { %v2335_v11 = vpack.c.bf16 %v2333_v9, %v2333_v9 }
 0xa49   :  { %2572 = vmatprep.mubr.bf16.mxu1 %v2335_v11 }
 0xa4a   :  { %2573 = vmatmul.mubr.bf16.vlgmr.msra.gmra.mrb[20].mxu1 %v2334_v12 }
 0xb1d   :  { %v2574_v20 = vpop.f32.mrb[20].mxu1 }
 0xb1e   :  { %v2575_v21 = vadd.f32 %v2574_v20, %v2373_v18  ;;  %v2576_v22 = vpop.f32.mrb[21].mxu1 }
 0xb1f   :  { %v2577_v15 = vadd.f32 %v2576_v22, %v2377_v19  ;;  %v2578_v23 = vpop.f32.mrb[22].mxu1 }
 0xb20   :  { %v2581_v16 = vmax.f32 %v2575_v21, 0.0  ;;  %v2579_v24 = vpop.f32.mrb[23].mxu1 }
 0xb21   :  { %v2582_v25 = vmax.f32 %v2577_v15, 0.0 }
 0xb22   :  { %v2583_v27 = vpack.c.bf16 %v2581_v16, %v2581_v16 }
 0xb23   :  { %v2584_v26 = vpack.c.bf16 %v2582_v25, %v2582_v25 }
 0xb25   :  { %2752 = vmatprep.mubr.bf16.mxu0 %v2584_v26 }
 0xb26   :  { %2753 = vmatmul.mubr.bf16.vlgmr.msra.gmra.mrb[16].mxu0 %v2583_v27 }
 0xbf9   :  { %v3099_v28 = vpop.f32.mrb[16].mxu0 }
 0xbfa   :  { %v3100_v5 = vpop.f32.mrb[17].mxu0 }
 0xbfb   :  { %v3101_v30 = vadd.f32 %v3100_v5, %v3099_v28  ;;  %v3102_v7 = vpop.f32.mrb[18].mxu0 }
 0xbfc   :  { %v3103_v31 = vpop.f32.mrb[19].mxu0 }
 0xbfd   :  { %v2755_v32 = vadd.f32 %v3101_v30, %v3064_v29 }
 0xbff   :  { %3542 = vtanh.f32 %v2755_v32 }
 0xc09   :  { %v3543_v35 = vpop.eup %3542 }
 0xc0a   :  { %v2766_v37 = vmul.f32 %v3543_v35, %v3081_v33 }
 0xc0c   :  { %v2772_v38 = vadd.f32 %v3082_v36, %v2766_v37 }
 0xc0e   :  { %v2781_v40 = vsel %vm2780_vm1, %v2772_v38, %v2774_v34 }
 0xc0f   :  { %v2783_v41 = vsel %vm2782_vm2, %v2781_v40, %v2778_v39 }
 0xc10   :  { %2785 = vst.msk [vmem:[%s4763_s22] sm:$0xff] %vm2784_vm3, %v2783_v41 }
 0xc11   :  { %2790 = vsyncpa [#allocation3], 1 }
 0xc12   :  { %2791 = vsyncpa [#allocation5], 1 }
 0xc13   :  { %2792 = vsyncpa [#allocation8], 1 }
 0xc14   :  { %2793 = vsyncpa [#allocation11], 1 }
 0xc15   :  { %2794 = vsyncpa [#allocation14], 1 }
 0xc16   :  { %2795 = vsyncpa [#allocation17], 1 }
 0xc17   :  { %2796 = vsyncpa [#allocation20], 1 }
 0xc18   :  { %2797 = vsyncpa [#allocation23], 1 }
 0xc19   :  { %2798 = vsyncpa [#allocation26], 1 }
 0xc1a   :  { %2799 = vsyncpa [#allocation29], 1 }
 0xc1b   :  { %2800 = vsyncpa [#allocation32], 1 }

</bundles_post_ra>
